<compile_context>
chip_gen: v6e
topology: v6e:2x2x1
jax: 0.10.0
libtpu: 0.0.40
codegen_flags: <defaults>
</compile_context>

<pallas_src>
import functools

import jax
import jax.numpy as jnp
from jax import lax
from jax.experimental import pallas as pl
from jax.experimental.pallas import tpu as pltpu  # noqa: F401  (TPU backend)

LANES = 128  # TPU vreg lane width; final output is padded to this.


def _act(y, activation):
    if activation == "relu":
        return jnp.maximum(y, 0.0)
    return jnp.tanh(y)  # 'tanh'


def _pool_combine(vals, pool):
    if pool == "max":
        out = vals[0]
        for v in vals[1:]:
            out = jnp.maximum(out, v)
        return out
    out = vals[0]
    for v in vals[1:]:
        out = out + v
    return out * (1.0 / len(vals))


# ----------------------------------------------------------------------------
# Fused Pallas kernel: the whole Net1 forward pass.
# ----------------------------------------------------------------------------
def _net1_kernel(p1_ref, w1_ref, b1_ref, w2_ref, b2_ref, w3_ref, b3_ref,
                 w4_ref, b4_ref, o_ref, *, batch, pool, activation):
    """p1_ref : [4*B*36, 9]  conv1 im2col patches; rows ordered (dp,dq,b,po,qo)
                             so the 2x2 pool is an elementwise combine of four
                             contiguous row blocks.  Columns = (kh*3+kw).
       w1_ref : [9, 32]      conv1 weight, rows=taps, lanes=cout
       b1_ref : [1, 32]
       w2_ref : [288, 64]    conv2 weight, rows=(kh,kw,cin) compact, lanes=cout
       b2_ref : [1, 64]
       w3_ref : [256, H]     fc1 weight; NCHW flatten order folded in (rows=(pq,c))
       b3_ref : [1, H]
       w4_ref : [H, 128]     fc2 weight, output lanes zero-padded to 128
       b4_ref : [1, 128]
       o_ref  : [bpad, 128]  padded logits; wrapper slices [:B, :10]
    """
    c1 = w1_ref.shape[1]   # 32 conv1 channels
    c2 = w2_ref.shape[1]   # 64 conv2 channels

    # ---- stage 1: conv1 as one GEMM, block-wise 2x2 pool, bias, act ---------
    y1 = jnp.dot(p1_ref[...], w1_ref[...],
                 preferred_element_type=jnp.float32)          # [4*B*36, c1]
    blk1 = batch * 36
    pooled1 = _pool_combine([y1[s * blk1:(s + 1) * blk1, :] for s in range(4)],
                            pool)                             # [B*36, c1]
    h1 = _act(pooled1 + b1_ref[...], activation)
    h1 = h1.reshape(batch, 6, 6, c1)                          # rows (b, po, qo)

    # ---- stage 2: conv2 as 9 per-tap GEMM accumulations ---------------------
    # Tap (kh,kw): static window h1[:, kh:kh+4, kw:kw+4, :] covers all 4x4
    # conv2 output positions; accumulate dot(win, w2_tap) in f32.
    acc2 = None
    for kh in range(3):
        for kw in range(3):
            win = h1[:, kh:kh + 4, kw:kw + 4, :].reshape(batch * 16, c1)
            tap = kh * 3 + kw
            wtap = w2_ref[tap * c1:(tap + 1) * c1, :]          # [c1, c2]
            t = jnp.dot(win, wtap, preferred_element_type=jnp.float32)
            acc2 = t if acc2 is None else acc2 + t             # [16B, c2]

    # 2x2/2 pool over the 4x4 conv2 grid (rows of acc2 = (b, i2, j2)).
    a = acc2.reshape(batch, 2, 2, 2, 2, c2)                    # (b, po, dp, qo, dq, c)
    slots = [a[:, :, dp, :, dq, :] for dp in range(2) for dq in range(2)]
    pooled2 = _pool_combine(slots, pool)                       # [B, 2, 2, c2]
    h2 = _act(pooled2 + b2_ref[...], activation)

    # ---- fc1 + act + fc2 ----------------------------------------------------
    # xfc lanes ordered (pq, c); PyTorch's NCHW flatten (c*4 + pq) is absorbed
    # by the trace-time permutation of w3 in prepare_params().
    xfc = jnp.concatenate([h2[:, po, qo, :] for po in range(2) for qo in range(2)],
                          axis=-1)                             # [B, 4*c2] = [B, 256]
    pad_rows = o_ref.shape[0] - batch
    if pad_rows:
        xfc = jnp.concatenate(
            [xfc, jnp.zeros((pad_rows, xfc.shape[1]), jnp.float32)], axis=0)
    h3 = _act(jnp.dot(xfc, w3_ref[...], preferred_element_type=jnp.float32)
              + b3_ref[...], activation)                       # [bpad, H]
    o_ref[...] = (jnp.dot(h3, w4_ref[...], preferred_element_type=jnp.float32)
                  + b4_ref[...])                               # [bpad, 128]


# ----------------------------------------------------------------------------
# One-time weight re-layout (cache the result; do NOT call per forward pass).
# ----------------------------------------------------------------------------
def prepare_params(params):
    f32 = jnp.float32
    hidden = params["fc1_w"].shape[0]
    nout = params["fc2_w"].shape[0]

    # conv1: [9, 32] rows=(kh*3+kw), cols=cout
    w1 = params["w1"].astype(f32).reshape(32, 9).T
    b1 = params["b1"].astype(f32).reshape(1, 32)

    # conv2: compact [(kh,kw,cin), cout] = [288, 64] (no cin/cout zero padding)
    w2 = jnp.transpose(params["w2"].astype(f32), (2, 3, 1, 0)).reshape(9 * 32, 64)
    b2 = params["b2"].astype(f32).reshape(1, 64)

    # fc1: fold PyTorch's NCHW flatten (feature = c*4 + po*2 + qo) into a
    # permutation so the kernel's lane order (pq, c) is correct; keep compact.
    w3 = params["fc1_w"].astype(f32).T.reshape(64, 4, hidden)   # [c, pq, n]
    w3 = jnp.transpose(w3, (1, 0, 2)).reshape(4 * 64, hidden)   # [(pq, c), n]
    b3 = params["fc1_b"].astype(f32).reshape(1, hidden)

    # fc2: pad only the OUTPUT lanes to 128 for a lane-dense final store.
    w4 = jnp.pad(params["fc2_w"].astype(f32).T, ((0, 0), (0, LANES - nout)))
    b4 = jnp.pad(params["fc2_b"].astype(f32).reshape(1, nout),
                 ((0, 0), (0, LANES - nout)))

    return dict(w1=w1, b1=b1, w2=w2, b2=b2, w3=w3, b3=b3, w4=w4, b4=b4)


# ----------------------------------------------------------------------------
# Per-call wrapper: trace-time conv1 im2col + one pallas_call.
# ----------------------------------------------------------------------------
def net1_forward(x_nchw, prep, *, nout, pool, activation):
    B, cin, H, W = x_nchw.shape
    assert (cin, H, W) == (1, 14, 14), "Net1 expects [B, 1, 14, 14] inputs"
    hidden = prep["w3"].shape[1]

    # conv1 im2col at trace time.  Rows ordered (dp, dq, b, po, qo) with the
    # conv1 output position (i, j) = (2*po+dp, 2*qo+dq), cols = (kh*3+kw), so
    # the in-kernel 2x2 pool is an elementwise combine of 4 row blocks.
    x2 = x_nchw.astype(jnp.float32).reshape(B, 14, 14)
    cols = [x2[:, kh:kh + 12, kw:kw + 12] for kh in range(3) for kw in range(3)]
    pat = jnp.stack(cols, axis=-1)                   # [B, 12, 12, 9]
    pat = pat.reshape(B, 6, 2, 6, 2, 9)              # (b, po, dp, qo, dq, k)
    pat = jnp.transpose(pat, (2, 4, 0, 1, 3, 5))     # (dp, dq, b, po, qo, k)
    p1 = pat.reshape(4 * B * 36, 9)

    bpad = max(8, ((B + 7) // 8) * 8)                # sublane-dense output tile

    ins = (p1, prep["w1"], prep["b1"], prep["w2"], prep["b2"],
           prep["w3"], prep["b3"], prep["w4"], prep["b4"])

    flops = 2 * ((4 * B * 36) * 9 * 32          # conv1 GEMM
                 + 9 * (B * 16) * 32 * 64       # conv2 per-tap GEMMs
                 + bpad * 256 * hidden          # fc1
                 + bpad * hidden * LANES)       # fc2
    transcendentals = (B * 36 * 32 + B * 4 * 64 + bpad * hidden) \
        if activation == "tanh" else 0
    bytes_accessed = 4 * (sum(int(v.size) for v in ins) + bpad * LANES)

    kernel = functools.partial(_net1_kernel, batch=B, pool=pool,
                               activation=activation)
    out = pl.pallas_call(
        kernel,
        out_shape=jax.ShapeDtypeStruct((bpad, LANES), jnp.float32),
        in_specs=[pl.BlockSpec(v.shape, lambda: (0,) * v.ndim) for v in ins],
        out_specs=pl.BlockSpec((bpad, LANES), lambda: (0, 0)),
        cost_estimate=pl.CostEstimate(flops=flops,
                                      transcendentals=transcendentals,
                                      bytes_accessed=bytes_accessed),
    )(*ins)
    return out[:B, :nout]


# ----------------------------------------------------------------------------
# Pure-JAX reference (correctness check only)
# ----------------------------------------------------------------------------
def _ref_forward(x, p, *, pool, activation):
    act = (lambda v: jnp.maximum(v, 0.0)) if activation == "relu" else jnp.tanh

    def do_pool(v):
        if pool == "max":
            return lax.reduce_window(v, -jnp.inf, lax.max, (1, 1, 2, 2), (1, 1, 2, 2), "VALID")
        return lax.reduce_window(v, 0.0, lax.add, (1, 1, 2, 2), (1, 1, 2, 2), "VALID") * 0.25

    dn = ("NCHW", "OIHW", "NCHW")
    y = lax.conv_general_dilated(x, p["w1"], (1, 1), "VALID", dimension_numbers=dn)
    y = act(do_pool(y + p["b1"][None, :, None, None]))
    y = lax.conv_general_dilated(y, p["w2"], (1, 1), "VALID", dimension_numbers=dn)
    y = act(do_pool(y + p["b2"][None, :, None, None]))
    y = y.reshape(y.shape[0], -1)
    y = act(y @ p["fc1_w"].T + p["fc1_b"])
    return y @ p["fc2_w"].T + p["fc2_b"]


# ----------------------------------------------------------------------------
if __name__ == "__main__":
    param = {"hidden": 32, "activation": "relu", "pool": "max"}

    key = jax.random.PRNGKey(0)
    ks = jax.random.split(key, 9)
    params = {
        "w1": jax.random.normal(ks[0], (32, 1, 3, 3), jnp.float32) * 0.1,
        "b1": jax.random.normal(ks[1], (32,), jnp.float32) * 0.1,
        "w2": jax.random.normal(ks[2], (64, 32, 3, 3), jnp.float32) * 0.05,
        "b2": jax.random.normal(ks[3], (64,), jnp.float32) * 0.1,
        "fc1_w": jax.random.normal(ks[4], (param["hidden"], 256), jnp.float32) * 0.05,
        "fc1_b": jax.random.normal(ks[5], (param["hidden"],), jnp.float32) * 0.1,
        "fc2_w": jax.random.normal(ks[6], (10, param["hidden"]), jnp.float32) * 0.1,
        "fc2_b": jax.random.normal(ks[7], (10,), jnp.float32) * 0.1,
    }

    # 14x14 single-channel input so the flatten gives exactly 256 features.
    x = jax.random.normal(ks[8], (2, 1, 14, 14), jnp.float32)

    # One-time weight re-layout (cached; not repeated inside the jitted call).
    prep = jax.tree_util.tree_map(jax.block_until_ready, prepare_params(params))

    fwd = jax.jit(functools.partial(net1_forward, nout=10, pool=param["pool"],
                                    activation=param["activation"]))
    out = jax.block_until_ready(fwd(x, prep))

    ref = jax.block_until_ready(
        _ref_forward(x, params, pool=param["pool"], activation=param["activation"]))

    assert out.shape == (2, 10)
    assert jnp.allclose(out, ref, atol=1e-4, rtol=1e-4), float(jnp.max(jnp.abs(out - ref)))

    print("KERNEL_OK")
</pallas_src>

<mosaic_0001>
module attributes {stable_mosaic.version = 11 : i64} {
  func.func @_net1_kernel(%arg0: memref<288x9xf32, #tpu.memory_space<vmem>>, %arg1: memref<9x32xf32, #tpu.memory_space<vmem>>, %arg2: memref<1x32xf32, #tpu.memory_space<vmem>>, %arg3: memref<288x64xf32, #tpu.memory_space<vmem>>, %arg4: memref<1x64xf32, #tpu.memory_space<vmem>>, %arg5: memref<256x32xf32, #tpu.memory_space<vmem>>, %arg6: memref<1x32xf32, #tpu.memory_space<vmem>>, %arg7: memref<32x128xf32, #tpu.memory_space<vmem>>, %arg8: memref<1x128xf32, #tpu.memory_space<vmem>>, %arg9: memref<8x128xf32, #tpu.memory_space<vmem>>) attributes {dimension_semantics = [], scalar_prefetch = 0 : i64, scratch_operands = 0 : i64, tpu.core_type = #tpu.core_type<tc>} {
    %c0 = arith.constant 0 : index
    %c0_0 = arith.constant 0 : index
    %0 = vector.load %arg0[%c0, %c0_0] : memref<288x9xf32, #tpu.memory_space<vmem>>, vector<288x9xf32>
    %c0_1 = arith.constant 0 : index
    %c0_2 = arith.constant 0 : index
    %1 = vector.load %arg1[%c0_1, %c0_2] : memref<9x32xf32, #tpu.memory_space<vmem>>, vector<9x32xf32>
    %cst = arith.constant dense<0.000000e+00> : vector<288x32xf32>
    %2 = tpu.matmul %0, %1, %cst {dimension_numbers = #tpu.dot_dimension_numbers<[1], [0], [0], [1], [0, 0, 1, 1], [], []>} : vector<288x9xf32>, vector<9x32xf32>, vector<288x32xf32> -> vector<288x32xf32>
    %3 = vector.extract_strided_slice %2 {offsets = [0, 0], sizes = [72, 32], strides = [1, 1]} : vector<288x32xf32> to vector<72x32xf32>
    %4 = vector.extract_strided_slice %2 {offsets = [72, 0], sizes = [72, 32], strides = [1, 1]} : vector<288x32xf32> to vector<72x32xf32>
    %5 = vector.extract_strided_slice %2 {offsets = [144, 0], sizes = [72, 32], strides = [1, 1]} : vector<288x32xf32> to vector<72x32xf32>
    %6 = vector.extract_strided_slice %2 {offsets = [216, 0], sizes = [72, 32], strides = [1, 1]} : vector<288x32xf32> to vector<72x32xf32>
    %7 = arith.maximumf %3, %4 : vector<72x32xf32>
    %8 = arith.maximumf %7, %5 : vector<72x32xf32>
    %9 = arith.maximumf %8, %6 : vector<72x32xf32>
    %c0_3 = arith.constant 0 : index
    %c0_4 = arith.constant 0 : index
    %10 = vector.load %arg2[%c0_3, %c0_4] : memref<1x32xf32, #tpu.memory_space<vmem>>, vector<1x32xf32>
    %11 = vector.broadcast %10 : vector<1x32xf32> to vector<72x32xf32>
    %12 = arith.addf %9, %11 : vector<72x32xf32>
    %cst_5 = arith.constant 0.000000e+00 : f32
    %13 = vector.broadcast %cst_5 : f32 to vector<72x32xf32>
    %14 = arith.maximumf %12, %13 : vector<72x32xf32>
    %15 = vector.shape_cast %14 : vector<72x32xf32> to vector<2x6x6x32xf32>
    %16 = vector.extract_strided_slice %15 {offsets = [0, 0, 0, 0], sizes = [2, 4, 4, 32], strides = [1, 1, 1, 1]} : vector<2x6x6x32xf32> to vector<2x4x4x32xf32>
    %17 = vector.shape_cast %16 : vector<2x4x4x32xf32> to vector<32x32xf32>
    %c0_6 = arith.constant 0 : index
    %c0_7 = arith.constant 0 : index
    %18 = vector.load %arg3[%c0_6, %c0_7] : memref<288x64xf32, #tpu.memory_space<vmem>>, vector<32x64xf32>
    %cst_8 = arith.constant dense<0.000000e+00> : vector<32x64xf32>
    %19 = tpu.matmul %17, %18, %cst_8 {dimension_numbers = #tpu.dot_dimension_numbers<[1], [0], [0], [1], [0, 0, 1, 1], [], []>} : vector<32x32xf32>, vector<32x64xf32>, vector<32x64xf32> -> vector<32x64xf32>
    %20 = vector.extract_strided_slice %15 {offsets = [0, 0, 1, 0], sizes = [2, 4, 4, 32], strides = [1, 1, 1, 1]} : vector<2x6x6x32xf32> to vector<2x4x4x32xf32>
    %21 = vector.shape_cast %20 : vector<2x4x4x32xf32> to vector<32x32xf32>
    %c32 = arith.constant 32 : index
    %c0_9 = arith.constant 0 : index
    %22 = vector.load %arg3[%c32, %c0_9] : memref<288x64xf32, #tpu.memory_space<vmem>>, vector<32x64xf32>
    %cst_10 = arith.constant dense<0.000000e+00> : vector<32x64xf32>
    %23 = tpu.matmul %21, %22, %cst_10 {dimension_numbers = #tpu.dot_dimension_numbers<[1], [0], [0], [1], [0, 0, 1, 1], [], []>} : vector<32x32xf32>, vector<32x64xf32>, vector<32x64xf32> -> vector<32x64xf32>
    %24 = arith.addf %19, %23 : vector<32x64xf32>
    %25 = vector.extract_strided_slice %15 {offsets = [0, 0, 2, 0], sizes = [2, 4, 4, 32], strides = [1, 1, 1, 1]} : vector<2x6x6x32xf32> to vector<2x4x4x32xf32>
    %26 = vector.shape_cast %25 : vector<2x4x4x32xf32> to vector<32x32xf32>
    %c64 = arith.constant 64 : index
    %c0_11 = arith.constant 0 : index
    %27 = vector.load %arg3[%c64, %c0_11] : memref<288x64xf32, #tpu.memory_space<vmem>>, vector<32x64xf32>
    %cst_12 = arith.constant dense<0.000000e+00> : vector<32x64xf32>
    %28 = tpu.matmul %26, %27, %cst_12 {dimension_numbers = #tpu.dot_dimension_numbers<[1], [0], [0], [1], [0, 0, 1, 1], [], []>} : vector<32x32xf32>, vector<32x64xf32>, vector<32x64xf32> -> vector<32x64xf32>
    %29 = arith.addf %24, %28 : vector<32x64xf32>
    %30 = vector.extract_strided_slice %15 {offsets = [0, 1, 0, 0], sizes = [2, 4, 4, 32], strides = [1, 1, 1, 1]} : vector<2x6x6x32xf32> to vector<2x4x4x32xf32>
    %31 = vector.shape_cast %30 : vector<2x4x4x32xf32> to vector<32x32xf32>
    %c96 = arith.constant 96 : index
    %c0_13 = arith.constant 0 : index
    %32 = vector.load %arg3[%c96, %c0_13] : memref<288x64xf32, #tpu.memory_space<vmem>>, vector<32x64xf32>
    %cst_14 = arith.constant dense<0.000000e+00> : vector<32x64xf32>
    %33 = tpu.matmul %31, %32, %cst_14 {dimension_numbers = #tpu.dot_dimension_numbers<[1], [0], [0], [1], [0, 0, 1, 1], [], []>} : vector<32x32xf32>, vector<32x64xf32>, vector<32x64xf32> -> vector<32x64xf32>
    %34 = arith.addf %29, %33 : vector<32x64xf32>
    %35 = vector.extract_strided_slice %15 {offsets = [0, 1, 1, 0], sizes = [2, 4, 4, 32], strides = [1, 1, 1, 1]} : vector<2x6x6x32xf32> to vector<2x4x4x32xf32>
    %36 = vector.shape_cast %35 : vector<2x4x4x32xf32> to vector<32x32xf32>
    %c128 = arith.constant 128 : index
    %c0_15 = arith.constant 0 : index
    %37 = vector.load %arg3[%c128, %c0_15] : memref<288x64xf32, #tpu.memory_space<vmem>>, vector<32x64xf32>
    %cst_16 = arith.constant dense<0.000000e+00> : vector<32x64xf32>
    %38 = tpu.matmul %36, %37, %cst_16 {dimension_numbers = #tpu.dot_dimension_numbers<[1], [0], [0], [1], [0, 0, 1, 1], [], []>} : vector<32x32xf32>, vector<32x64xf32>, vector<32x64xf32> -> vector<32x64xf32>
    %39 = arith.addf %34, %38 : vector<32x64xf32>
    %40 = vector.extract_strided_slice %15 {offsets = [0, 1, 2, 0], sizes = [2, 4, 4, 32], strides = [1, 1, 1, 1]} : vector<2x6x6x32xf32> to vector<2x4x4x32xf32>
    %41 = vector.shape_cast %40 : vector<2x4x4x32xf32> to vector<32x32xf32>
    %c160 = arith.constant 160 : index
    %c0_17 = arith.constant 0 : index
    %42 = vector.load %arg3[%c160, %c0_17] : memref<288x64xf32, #tpu.memory_space<vmem>>, vector<32x64xf32>
    %cst_18 = arith.constant dense<0.000000e+00> : vector<32x64xf32>
    %43 = tpu.matmul %41, %42, %cst_18 {dimension_numbers = #tpu.dot_dimension_numbers<[1], [0], [0], [1], [0, 0, 1, 1], [], []>} : vector<32x32xf32>, vector<32x64xf32>, vector<32x64xf32> -> vector<32x64xf32>
    %44 = arith.addf %39, %43 : vector<32x64xf32>
    %45 = vector.extract_strided_slice %15 {offsets = [0, 2, 0, 0], sizes = [2, 4, 4, 32], strides = [1, 1, 1, 1]} : vector<2x6x6x32xf32> to vector<2x4x4x32xf32>
    %46 = vector.shape_cast %45 : vector<2x4x4x32xf32> to vector<32x32xf32>
    %c192 = arith.constant 192 : index
    %c0_19 = arith.constant 0 : index
    %47 = vector.load %arg3[%c192, %c0_19] : memref<288x64xf32, #tpu.memory_space<vmem>>, vector<32x64xf32>
    %cst_20 = arith.constant dense<0.000000e+00> : vector<32x64xf32>
    %48 = tpu.matmul %46, %47, %cst_20 {dimension_numbers = #tpu.dot_dimension_numbers<[1], [0], [0], [1], [0, 0, 1, 1], [], []>} : vector<32x32xf32>, vector<32x64xf32>, vector<32x64xf32> -> vector<32x64xf32>
    %49 = arith.addf %44, %48 : vector<32x64xf32>
    %50 = vector.extract_strided_slice %15 {offsets = [0, 2, 1, 0], sizes = [2, 4, 4, 32], strides = [1, 1, 1, 1]} : vector<2x6x6x32xf32> to vector<2x4x4x32xf32>
    %51 = vector.shape_cast %50 : vector<2x4x4x32xf32> to vector<32x32xf32>
    %c224 = arith.constant 224 : index
    %c0_21 = arith.constant 0 : index
    %52 = vector.load %arg3[%c224, %c0_21] : memref<288x64xf32, #tpu.memory_space<vmem>>, vector<32x64xf32>
    %cst_22 = arith.constant dense<0.000000e+00> : vector<32x64xf32>
    %53 = tpu.matmul %51, %52, %cst_22 {dimension_numbers = #tpu.dot_dimension_numbers<[1], [0], [0], [1], [0, 0, 1, 1], [], []>} : vector<32x32xf32>, vector<32x64xf32>, vector<32x64xf32> -> vector<32x64xf32>
    %54 = arith.addf %49, %53 : vector<32x64xf32>
    %55 = vector.extract_strided_slice %15 {offsets = [0, 2, 2, 0], sizes = [2, 4, 4, 32], strides = [1, 1, 1, 1]} : vector<2x6x6x32xf32> to vector<2x4x4x32xf32>
    %56 = vector.shape_cast %55 : vector<2x4x4x32xf32> to vector<32x32xf32>
    %c256 = arith.constant 256 : index
    %c0_23 = arith.constant 0 : index
    %57 = vector.load %arg3[%c256, %c0_23] : memref<288x64xf32, #tpu.memory_space<vmem>>, vector<32x64xf32>
    %cst_24 = arith.constant dense<0.000000e+00> : vector<32x64xf32>
    %58 = tpu.matmul %56, %57, %cst_24 {dimension_numbers = #tpu.dot_dimension_numbers<[1], [0], [0], [1], [0, 0, 1, 1], [], []>} : vector<32x32xf32>, vector<32x64xf32>, vector<32x64xf32> -> vector<32x64xf32>
    %59 = arith.addf %54, %58 : vector<32x64xf32>
    %60 = vector.shape_cast %59 : vector<32x64xf32> to vector<2x2x2x2x2x64xf32>
    %61 = vector.extract_strided_slice %60 {offsets = [0, 0, 0, 0, 0, 0], sizes = [2, 2, 1, 2, 1, 64], strides = [1, 1, 1, 1, 1, 1]} : vector<2x2x2x2x2x64xf32> to vector<2x2x1x2x1x64xf32>
    %62 = vector.shape_cast %61 : vector<2x2x1x2x1x64xf32> to vector<2x2x2x64xf32>
    %63 = vector.extract_strided_slice %60 {offsets = [0, 0, 0, 0, 1, 0], sizes = [2, 2, 1, 2, 1, 64], strides = [1, 1, 1, 1, 1, 1]} : vector<2x2x2x2x2x64xf32> to vector<2x2x1x2x1x64xf32>
    %64 = vector.shape_cast %63 : vector<2x2x1x2x1x64xf32> to vector<2x2x2x64xf32>
    %65 = vector.extract_strided_slice %60 {offsets = [0, 0, 1, 0, 0, 0], sizes = [2, 2, 1, 2, 1, 64], strides = [1, 1, 1, 1, 1, 1]} : vector<2x2x2x2x2x64xf32> to vector<2x2x1x2x1x64xf32>
    %66 = vector.shape_cast %65 : vector<2x2x1x2x1x64xf32> to vector<2x2x2x64xf32>
    %67 = vector.extract_strided_slice %60 {offsets = [0, 0, 1, 0, 1, 0], sizes = [2, 2, 1, 2, 1, 64], strides = [1, 1, 1, 1, 1, 1]} : vector<2x2x2x2x2x64xf32> to vector<2x2x1x2x1x64xf32>
    %68 = vector.shape_cast %67 : vector<2x2x1x2x1x64xf32> to vector<2x2x2x64xf32>
    %69 = arith.maximumf %62, %64 : vector<2x2x2x64xf32>
    %70 = arith.maximumf %69, %66 : vector<2x2x2x64xf32>
    %71 = arith.maximumf %70, %68 : vector<2x2x2x64xf32>
    %c0_25 = arith.constant 0 : index
    %c0_26 = arith.constant 0 : index
    %72 = vector.load %arg4[%c0_25, %c0_26] : memref<1x64xf32, #tpu.memory_space<vmem>>, vector<1x64xf32>
    %73 = vector.shape_cast %72 : vector<1x64xf32> to vector<1x1x1x64xf32>
    %74 = vector.broadcast %73 : vector<1x1x1x64xf32> to vector<2x2x2x64xf32>
    %75 = arith.addf %71, %74 : vector<2x2x2x64xf32>
    %cst_27 = arith.constant 0.000000e+00 : f32
    %76 = vector.broadcast %cst_27 : f32 to vector<2x2x2x64xf32>
    %77 = arith.maximumf %75, %76 : vector<2x2x2x64xf32>
    %78 = vector.extract_strided_slice %77 {offsets = [0, 0, 0, 0], sizes = [2, 1, 1, 64], strides = [1, 1, 1, 1]} : vector<2x2x2x64xf32> to vector<2x1x1x64xf32>
    %79 = vector.shape_cast %78 : vector<2x1x1x64xf32> to vector<2x64xf32>
    %80 = vector.extract_strided_slice %77 {offsets = [0, 0, 1, 0], sizes = [2, 1, 1, 64], strides = [1, 1, 1, 1]} : vector<2x2x2x64xf32> to vector<2x1x1x64xf32>
    %81 = vector.shape_cast %80 : vector<2x1x1x64xf32> to vector<2x64xf32>
    %82 = vector.extract_strided_slice %77 {offsets = [0, 1, 0, 0], sizes = [2, 1, 1, 64], strides = [1, 1, 1, 1]} : vector<2x2x2x64xf32> to vector<2x1x1x64xf32>
    %83 = vector.shape_cast %82 : vector<2x1x1x64xf32> to vector<2x64xf32>
    %84 = vector.extract_strided_slice %77 {offsets = [0, 1, 1, 0], sizes = [2, 1, 1, 64], strides = [1, 1, 1, 1]} : vector<2x2x2x64xf32> to vector<2x1x1x64xf32>
    %85 = vector.shape_cast %84 : vector<2x1x1x64xf32> to vector<2x64xf32>
    %86 = tpu.concatenate %79, %81, %83, %85 in 1 : vector<2x64xf32>, vector<2x64xf32>, vector<2x64xf32>, vector<2x64xf32> -> vector<2x256xf32>
    %cst_28 = arith.constant 0.000000e+00 : f32
    %87 = vector.broadcast %cst_28 : f32 to vector<6x256xf32>
    %88 = tpu.concatenate %86, %87 in 0 : vector<2x256xf32>, vector<6x256xf32> -> vector<8x256xf32>
    %c0_29 = arith.constant 0 : index
    %c0_30 = arith.constant 0 : index
    %89 = vector.load %arg5[%c0_29, %c0_30] : memref<256x32xf32, #tpu.memory_space<vmem>>, vector<256x32xf32>
    %cst_31 = arith.constant dense<0.000000e+00> : vector<8x32xf32>
    %90 = tpu.matmul %88, %89, %cst_31 {dimension_numbers = #tpu.dot_dimension_numbers<[1], [0], [0], [1], [0, 0, 1, 1], [], []>} : vector<8x256xf32>, vector<256x32xf32>, vector<8x32xf32> -> vector<8x32xf32>
    %c0_32 = arith.constant 0 : index
    %c0_33 = arith.constant 0 : index
    %91 = vector.load %arg6[%c0_32, %c0_33] : memref<1x32xf32, #tpu.memory_space<vmem>>, vector<1x32xf32>
    %92 = vector.broadcast %91 : vector<1x32xf32> to vector<8x32xf32>
    %93 = arith.addf %90, %92 : vector<8x32xf32>
    %cst_34 = arith.constant 0.000000e+00 : f32
    %94 = vector.broadcast %cst_34 : f32 to vector<8x32xf32>
    %95 = arith.maximumf %93, %94 : vector<8x32xf32>
    %c0_35 = arith.constant 0 : index
    %c0_36 = arith.constant 0 : index
    %96 = vector.load %arg7[%c0_35, %c0_36] : memref<32x128xf32, #tpu.memory_space<vmem>>, vector<32x128xf32>
    %cst_37 = arith.constant dense<0.000000e+00> : vector<8x128xf32>
    %97 = tpu.matmul %95, %96, %cst_37 {dimension_numbers = #tpu.dot_dimension_numbers<[1], [0], [0], [1], [0, 0, 1, 1], [], []>} : vector<8x32xf32>, vector<32x128xf32>, vector<8x128xf32> -> vector<8x128xf32>
    %c0_38 = arith.constant 0 : index
    %c0_39 = arith.constant 0 : index
    %98 = vector.load %arg8[%c0_38, %c0_39] : memref<1x128xf32, #tpu.memory_space<vmem>>, vector<1x128xf32>
    %99 = vector.broadcast %98 : vector<1x128xf32> to vector<8x128xf32>
    %100 = arith.addf %97, %99 : vector<8x128xf32>
    %c0_40 = arith.constant 0 : index
    %c0_41 = arith.constant 0 : index
    %101 = vector.load %arg9[%c0_40, %c0_41] : memref<8x128xf32, #tpu.memory_space<vmem>>, vector<8x128xf32>
    tpu.vector_store %arg9[%c0_40, %c0_41], %100 {strides = array<i32>} : memref<8x128xf32, #tpu.memory_space<vmem>>, vector<8x128xf32>,
    return
  }
}

</mosaic_0001>

<bundles_post_ra>
// kernel: net1_forward.1
= control target key start
LH: loop header
LB: loop body
LE: loop exit
PB: predicated region body
PF: predicated region fallthrough
CT: control target
= control target key end

     0   :  { %vm179_vm0 = vcmask 1040384   ;;  %vm70_vm1 = vcmask 72704   ;;  %vm646_vm2 = vcmask 1042434   ;;  %vm648_vm3 = vcmask 1044484   ;;  %s3870_s1 = inlined_call_operand.vmem [shape: f32[9,32], index: 1, kind: input, shape index: {}]   ;;  %s3871_s0 = inlined_call_operand.vmem [shape: f32[288,9], index: 0, kind: input, shape index: {}]   ;;  %s3872_s3 = inlined_call_operand.vmem [shape: f32[288,64], index: 3, kind: input, shape index: {}]   ;;  %s3873_s2 = inlined_call_operand.vmem [shape: f32[1,32], index: 2, kind: input, shape index: {}]   ;;  %s3874_s5 = inlined_call_operand.vmem [shape: f32[256,32], index: 5, kind: input, shape index: {}]   ;;  %s3875_s4 = inlined_call_operand.vmem [shape: f32[1,64], index: 4, kind: input, shape index: {}]   ;;  %s3876_s7 = inlined_call_operand.vmem [shape: f32[32,128], index: 7, kind: input, shape index: {}]   ;;  %s3877_s6 = inlined_call_operand.vmem [shape: f32[1,32], index: 6, kind: input, shape index: {}]   ;;  %s3878_s8 = inlined_call_operand.vmem [shape: f32[1,128], index: 8, kind: input, shape index: {}]   ;;  %s3879_s9 = inlined_call_operand.vmem [shape: f32[8,128], index: 9, kind: output, shape index: {}]  }
   0x1   :  { %v69_v0 = vld [vmem:[%s3870_s1 + $0x8] sm:$0x1]  ;;  %v68_v1 = vld [vmem:[%s3870_s1] sm:$0xff]  ;;  %v34_v4 = vld [vmem:[%s3871_s0 + $0x10] sm:$0xff]  ;;  %vm650_vm4 = vcmask 1046534   ;;  %vm780_vm8 = vcmask 261120  }
   0x2   :  { %2648 = vmatprep.subr.msk.mxu0 %vm179_vm0, %v69_v0  ;;  %v32_v2 = vld [vmem:[%s3871_s0] sm:$0xff]  ;;  %v33_v3 = vld [vmem:[%s3871_s0 + $0x8] sm:$0xff]  ;;  %v35_v5 = vld [vmem:[%s3871_s0 + $0x18] sm:$0xff]  ;;  %vm2142_vm9 = vcmask 1041409   ;;  %vm2185_vm10 = vcmask 523264   ;;  %vm2188_vm11 = vcmask 1041408  }
   0x3   :  { %2649 = vmatpush3.msk.msra.mxu0 %vm179_vm0, %v69_v0  ;;  %2652 = vmatprep.mubr.msk.f32.mxu0 %vm70_vm1, %v32_v2  ;;  %v36_v6 = vld [vmem:[%s3871_s0 + $0x20] sm:$0xff]  ;;  %v37_v7 = vld [vmem:[%s3871_s0 + $0x28] sm:$0xff]  ;;  %v38_v8 = vld [vmem:[%s3871_s0 + $0x30] sm:$0xff]  ;;  %vm2850_vm12 = vmmov 0  }
   0x4   :  { %2650 = vmatprep.subr.mxu0 %v68_v1  ;;  %v39_v9 = vld [vmem:[%s3871_s0 + $0x38] sm:$0xff]  ;;  %v40_v10 = vld [vmem:[%s3871_s0 + $0x40] sm:$0xff]  ;;  %v41_v11 = vld [vmem:[%s3871_s0 + $0x48] sm:$0xff] }
   0x5   :  { %2651 = vmatpush3.msra.mxu0 %v68_v1  ;;  %v42_v12 = vld [vmem:[%s3871_s0 + $0x50] sm:$0xff]  ;;  %v43_v13 = vld [vmem:[%s3871_s0 + $0x58] sm:$0xff]  ;;  %v44_v14 = vld [vmem:[%s3871_s0 + $0x60] sm:$0xff] }
   0x6   :  { %2653 = vmatmul.mubr.msk.f32.vlgmr.msra.gmra.mxu0 %vm70_vm1, %v33_v3  ;;  %v45_v15 = vld [vmem:[%s3871_s0 + $0x68] sm:$0xff]  ;;  %v46_v16 = vld [vmem:[%s3871_s0 + $0x70] sm:$0xff]  ;;  %v47_v17 = vld [vmem:[%s3871_s0 + $0x78] sm:$0xff] }
   0x7   :  { %2655 = vmatprep.mubr.msk.f32.mxu0 %vm70_vm1, %v34_v4  ;;  %v48_v18 = vld [vmem:[%s3871_s0 + $0x80] sm:$0xff]  ;;  %v49_v19 = vld [vmem:[%s3871_s0 + $0x88] sm:$0xff]  ;;  %v50_v20 = vld [vmem:[%s3871_s0 + $0x90] sm:$0xff] }
   0x8   :  { %v51_v21 = vld [vmem:[%s3871_s0 + $0x98] sm:$0xff]  ;;  %v52_v22 = vld [vmem:[%s3871_s0 + $0xa0] sm:$0xff]  ;;  %v53_v23 = vld [vmem:[%s3871_s0 + $0xa8] sm:$0xff] }
   0x9   :  { %v54_v24 = vld [vmem:[%s3871_s0 + $0xb0] sm:$0xff]  ;;  %v55_v25 = vld [vmem:[%s3871_s0 + $0xb8] sm:$0xff]  ;;  %v56_v26 = vld [vmem:[%s3871_s0 + $0xc0] sm:$0xff] }
   0xa   :  { %2656 = vmatmul.mubr.msk.f32.gmra.mxu0 %vm70_vm1, %v35_v5  ;;  %v57_v27 = vld [vmem:[%s3871_s0 + $0xc8] sm:$0xff]  ;;  %v58_v28 = vld [vmem:[%s3871_s0 + $0xd0] sm:$0xff]  ;;  %v59_v29 = vld [vmem:[%s3871_s0 + $0xd8] sm:$0xff] }
   0xb   :  { %2658 = vmatprep.mubr.msk.f32.mxu0 %vm70_vm1, %v36_v6  ;;  %v60_v30 = vld [vmem:[%s3871_s0 + $0xe0] sm:$0xff]  ;;  %v61_v31 = vld [vmem:[%s3871_s0 + $0xe8] sm:$0xff]  ;;  %v62_v32 = vld [vmem:[%s3871_s0 + $0xf0] sm:$0xff] }
   0xc   :  { %v63_v33 = vld [vmem:[%s3871_s0 + $0xf8] sm:$0xff]  ;;  %v64_v34 = vld [vmem:[%s3871_s0 + $0x100] sm:$0xff]  ;;  %v65_v35 = vld [vmem:[%s3871_s0 + $0x108] sm:$0xff] }
   0xd   :  { %v66_v36 = vld [vmem:[%s3871_s0 + $0x110] sm:$0xff]  ;;  %v67_v37 = vld [vmem:[%s3871_s0 + $0x118] sm:$0xff]  ;;  %v709_v40 = vld [vmem:[%s3872_s3 + $0x28] sm:$0xff] }
   0xe   :  { %2659 = vmatmul.mubr.msk.f32.gmra.mxu0 %vm70_vm1, %v37_v7  ;;  %v711_v38 = vld [vmem:[%s3872_s3 + $0x38] sm:$0xff]  ;;  %v710_v39 = vld [vmem:[%s3872_s3 + $0x30] sm:$0xff]  ;;  %v708_v41 = vld [vmem:[%s3872_s3 + $0x20] sm:$0xff] }
   0xf   :  { %2661 = vmatprep.mubr.msk.f32.mxu0 %vm70_vm1, %v38_v8  ;;  %2706 = vmatprep.subr.mxu1 %v711_v38  ;;  %v3068_v42 = vld [vmem:[%s3872_s3 + $0x18] sm:$0xff]  ;;  %vm647_vm5 = vmor %vm179_vm0, %vm646_vm2 }
  0x10   :  { %2707 = vmatpush3.msra.mxu1 %v711_v38  ;;  %vm649_vm6 = vmor %vm647_vm5, %vm648_vm3 }
  0x11   :  { %2708 = vmatprep.subr.mxu1 %v710_v39  ;;  %vm3152_vm7 = vmor %vm649_vm6, %vm650_vm4 }
  0x12   :  { %2662 = vmatmul.mubr.msk.f32.gmra.mxu0 %vm70_vm1, %v39_v9  ;;  %2709 = vmatpush3.msra.mxu1 %v710_v39 }
  0x13   :  { %2664 = vmatprep.mubr.msk.f32.mxu0 %vm70_vm1, %v40_v10  ;;  %2710 = vmatprep.subr.mxu1 %v709_v40 }
  0x14   :  { %2711 = vmatpush3.msra.mxu1 %v709_v40 }
  0x15   :  { %2712 = vmatprep.subr.mxu1 %v708_v41 }
  0x16   :  { %2665 = vmatmul.mubr.msk.f32.gmra.mxu0 %vm70_vm1, %v41_v11  ;;  %2713 = vmatpush3.msra.mxu1 %v708_v41 }
  0x17   :  { %2667 = vmatprep.mubr.msk.f32.mxu0 %vm70_vm1, %v42_v12  ;;  %2720 = vmatprep.subr.mxu1 %v3068_v42 }
  0x1a   :  { %2668 = vmatmul.mubr.msk.f32.gmra.mxu0 %vm70_vm1, %v43_v13 }
  0x1b   :  { %2670 = vmatprep.mubr.msk.f32.mxu0 %vm70_vm1, %v44_v14  ;;  %v2847_v14 = vmov 1983009808  }
  0x1e   :  { %2671 = vmatmul.mubr.msk.f32.gmra.mxu0 %vm70_vm1, %v45_v15  ;;  %v491_v15 = vunpack.c.l.s4 %v2847_v14  ;;  %v1207_v14 = vld [vmem:[%s3872_s3 + $0x78] sm:$0xff] }
  0x1f   :  { %2673 = vmatprep.mubr.msk.f32.mxu0 %vm70_vm1, %v46_v16  ;;  %v493_v16 = vlaneseq }
  0x22   :  { %2674 = vmatmul.mubr.msk.f32.gmra.mxu0 %vm70_vm1, %v47_v17 }
  0x23   :  { %2676 = vmatprep.mubr.msk.f32.mxu0 %vm70_vm1, %v48_v18 }
  0x26   :  { %2677 = vmatmul.mubr.msk.f32.gmra.mxu0 %vm70_vm1, %v49_v19 }
  0x27   :  { %2679 = vmatprep.mubr.msk.f32.mxu0 %vm70_vm1, %v50_v20 }
  0x2a   :  { %2680 = vmatmul.mubr.msk.f32.gmra.mxu0 %vm70_vm1, %v51_v21 }
  0x2b   :  { %2682 = vmatprep.mubr.msk.f32.mxu0 %vm70_vm1, %v52_v22 }
  0x2e   :  { %2683 = vmatmul.mubr.msk.f32.gmra.mxu0 %vm70_vm1, %v53_v23 }
  0x2f   :  { %2685 = vmatprep.mubr.msk.f32.mxu0 %vm70_vm1, %v54_v24  ;;  %v3090_v24 = vld [vmem:[%s3873_s2] ss:$0 sm:$0xff] }
  0x32   :  { %2686 = vmatmul.mubr.msk.f32.gmra.mxu0 %vm70_vm1, %v55_v25 }
  0x33   :  { %2688 = vmatprep.mubr.msk.f32.mxu0 %vm70_vm1, %v56_v26 }
  0x36   :  { %2689 = vmatmul.mubr.msk.f32.gmra.mxu0 %vm70_vm1, %v57_v27 }
  0x37   :  { %2691 = vmatprep.mubr.msk.f32.mxu0 %vm70_vm1, %v58_v28  ;;  %v492_v28 = vunpack.c.0.s8 %v491_v15 }
  0x3a   :  { %2692 = vmatmul.mubr.msk.f32.gmra.mxu0 %vm70_vm1, %v59_v29  ;;  %v3092_v29 = vshrl.u32 %v493_v16, 7 }
  0x3b   :  { %2694 = vmatprep.mubr.msk.f32.mxu0 %vm70_vm1, %v60_v30 }
  0x3c   :  { %3890 = vst [vmem:[#allocation2_spill] sm:$0xff] %v3092_v29  ;;  %v3099_v38 = vsub.s32 %v492_v28, %v3092_v29 }
  0x3e   :  { %2695 = vmatmul.mubr.msk.f32.gmra.mxu0 %vm70_vm1, %v61_v31 }
  0x3f   :  { %2697 = vmatprep.mubr.msk.f32.mxu0 %vm70_vm1, %v62_v32 }
  0x42   :  { %2698 = vmatmul.mubr.msk.f32.gmra.mxu0 %vm70_vm1, %v63_v33 }
  0x43   :  { %2700 = vmatprep.mubr.msk.f32.mxu0 %vm70_vm1, %v64_v34 }
  0x46   :  { %2701 = vmatmul.mubr.msk.f32.gmra.mxu0 %vm70_vm1, %v65_v35 }
  0x47   :  { %2703 = vmatprep.mubr.msk.f32.mxu0 %vm70_vm1, %v66_v36 }
  0x4a   :  { %2704 = vmatmul.mubr.msk.f32.gmra.mxu0 %vm70_vm1, %v67_v37 }
  0xc6   :  { %v2654_v43 = vpop.f32.mrf.mxu0 }
  0xc8   :  { %v249_v44 = vpop.f32.mrf.mxu0 }
  0xca   :  { %v2657_v45 = vpop.f32.mrf.mxu0 }
  0xcc   :  { %v259_v46 = vpop.f32.mrf.mxu0 }
  0xce   :  { %v3071_v47 = vpop.f32.mrf.mxu0 }
  0xd0   :  { %v269_v48 = vpop.f32.mrf.mxu0 }
  0xd2   :  { %v3073_v49 = vpop.f32.mrf.mxu0 }
  0xd4   :  { %v279_v50 = vpop.f32.mrf.mxu0 }
  0xd6   :  { %v2666_v51 = vpop.f32.mrf.mxu0 }
  0xd7   :  { %v428_v8 = vmax.f32 %v249_v44, %v2666_v51 }
  0xd8   :  { %v3075_v52 = vpop.f32.mrf.mxu0 }
  0xda   :  { %v2669_v53 = vpop.f32.mrf.mxu0 }
  0xdb   :  { %v430_v10 = vmax.f32 %v259_v46, %v2669_v53 }
  0xdc   :  { %v299_v54 = vpop.f32.mrf.mxu0 }
  0xdd   :  { %v429_v11 = vmax.f32 %v2654_v43, %v299_v54 }
  0xde   :  { %v2672_v55 = vpop.f32.mrf.mxu0 }
  0xdf   :  { %v432_v12 = vmax.f32 %v269_v48, %v2672_v55 }
  0xe0   :  { %v309_v56 = vpop.f32.mrf.mxu0 }
  0xe1   :  { %v431_v20 = vmax.f32 %v2657_v45, %v309_v56 }
  0xe2   :  { %v2675_v57 = vpop.f32.mrf.mxu0 }
  0xe3   :  { %v434_v35 = vmax.f32 %v279_v50, %v2675_v57 }
  0xe4   :  { %v3077_v58 = vpop.f32.mrf.mxu0 }
  0xe5   :  { %v433_v53 = vmax.f32 %v3071_v47, %v3077_v58 }
  0xe6   :  { %v3079_v59 = vpop.f32.mrf.mxu0 }
  0xe7   :  { %v436_v60 = vmax.f32 %v3075_v52, %v3079_v59 }
  0xe8   :  { %v3083_v61 = vpop.f32.mrf.mxu0 }
  0xe9   :  { %v435_v54 = vmax.f32 %v3073_v49, %v3083_v61 }
  0xea   :  { %v2681_v62 = vpop.f32.mrf.mxu0 }
  0xeb   :  { %v438_v18 = vmax.f32 %v429_v11, %v2681_v62 }
  0xec   :  { %v339_v63 = vpop.f32.mrf.mxu0 }
  0xed   :  { %v437_v13 = vmax.f32 %v428_v8, %v339_v63 }
  0xee   :  { %v2684_v0 = vpop.f32.mrf.mxu0 }
  0xef   :  { %v440_v27 = vmax.f32 %v431_v20, %v2684_v0 }
  0xf0   :  { %v349_v1 = vpop.f32.mrf.mxu0 }
  0xf1   :  { %v439_v19 = vmax.f32 %v430_v10, %v349_v1 }
  0xf2   :  { %v2687_v2 = vpop.f32.mrf.mxu0 }
  0xf3   :  { %v442_v0 = vmax.f32 %v433_v53, %v2687_v2 }
  0xf4   :  { %v359_v3 = vpop.f32.mrf.mxu0 }
  0xf5   :  { %v441_v21 = vmax.f32 %v432_v12, %v359_v3 }
  0xf6   :  { %v2690_v4 = vpop.f32.mrf.mxu0 }
  0xf7   :  { %v444_v1 = vmax.f32 %v435_v54, %v2690_v4 }
  0xf8   :  { %v369_v5 = vpop.f32.mrf.mxu0 }
  0xf9   :  { %v443_v43 = vmax.f32 %v434_v35, %v369_v5 }
  0xfa   :  { %v2693_v6 = vpop.f32.mrf.mxu0 }
  0xfb   :  { %v446_v22 = vmax.f32 %v437_v13, %v2693_v6 }
  0xfc   :  { %v3085_v7 = vpop.f32.mrf.mxu0 }
  0xfd   :  { %v462_v32 = vadd.f32 %v3090_v24, %v446_v22  ;;  %v445_v6 = vmax.f32 %v436_v60, %v3085_v7 }
  0xfe   :  { %v2696_v9 = vpop.f32.mrf.mxu0 }
  0xff   :  { %v448_v25 = vmax.f32 %v439_v19, %v2696_v9  ;;  %v471_v44 = vmax.f32 %v462_v32, 0.0 }
 0x100   :  { %v389_v17 = vpop.f32.mrf.mxu0 }
 0x101   :  { %v447_v26 = vmax.f32 %v438_v18, %v389_v17  ;;  %v464_v36 = vadd.f32 %v3090_v24, %v448_v25  ;;  %v489_v3 = vcombine.high %v471_v44, %v471_v44  ;;  %v3119_v47 = vrot.slane %v471_v44, %v3099_v38 }
 0x102   :  { %v2699_v23 = vpop.f32.mrf.mxu0 }
 0x103   :  { %v450_v30 = vmax.f32 %v441_v21, %v2699_v23  ;;  %v463_v37 = vadd.f32 %v3090_v24, %v447_v26  ;;  %v473_v48 = vmax.f32 %v464_v36, 0.0  ;;  %v3143_v13 = vrot.slane %v489_v3, %v3099_v38 }
 0x104   :  { %v399_v31 = vpop.f32.mrf.mxu0  ;;  %v3147_v52 = vcombine.high %v3119_v47, %v3119_v47  ;;  %v2428_v35 = vrot.slane %v3119_v47, 9 }
 0x105   :  { %v466_v33 = vadd.f32 %v3090_v24, %v450_v30  ;;  %v449_v34 = vmax.f32 %v440_v27, %v399_v31  ;;  %v472_v50 = vmax.f32 %v463_v37, 0.0  ;;  %v523_v49 = vcombine.high %v473_v48, %v473_v48 }
 0x106   :  { %v2702_v41 = vpop.f32.mrf.mxu0  ;;  %v3131_v2 = vrot.slane %v473_v48, %v3099_v38 }
 0x107   :  { %v475_v39 = vmax.f32 %v466_v33, 0.0  ;;  %v465_v40 = vadd.f32 %v3090_v24, %v449_v34  ;;  %v452_v51 = vmax.f32 %v443_v43, %v2702_v41  ;;  %v506_v58 = vcombine.high %v472_v50, %v472_v50 }
 0x108   :  { %v409_v63 = vpop.f32.mrf.mxu0  ;;  %v3157_v15 = vrot.slane %v523_v49, %v3099_v38  ;;  %v3171_v23 = vcombine.high %v3131_v2, %v3131_v2  ;;  %v3195_v34 = vcombine.high %v3143_v13, %v3143_v13  ;;  %v654_v43 = vrot.slane %v3147_v52, 7 }
 0x109   :  { %v3103_v45 = vrot.slane %v475_v39, %v3099_v38  ;;  %v474_v46 = vmax.f32 %v465_v40, 0.0  ;;  %v468_v5 = vadd.f32 %v3090_v24, %v452_v51  ;;  %v451_v8 = vmax.f32 %v442_v0, %v409_v63 }
 0x10a   :  { %v557_v9 = vcombine.high %v475_v39, %v475_v39  ;;  %v2705_v7 = vpop.f32.mrf.mxu0  ;;  %v3160_v16 = vrot.slane %v506_v58, %v3099_v38  ;;  %v3203_v39 = vrot.slane %v472_v50, %v3099_v38  ;;  %v3220_v50 = vcombine.high %v3157_v15, %v3157_v15 }
 0x10b   :  { %3891 = vst [vmem:[#allocation3_spill] sm:$0xff] %v3103_v45  ;;  %v3112_v55 = vcombine.high %v3103_v45, %v3103_v45  ;;  %v1698_v56 = vrot.slane %v3103_v45, 7  ;;  %v540_v57 = vcombine.high %v474_v46, %v474_v46  ;;  %v3116_v62 = vrot.slane %v474_v46, %v3099_v38 }
 0x10c   :  { %v477_v18 = vmax.f32 %v468_v5, 0.0  ;;  %v467_v22 = vadd.f32 %v3090_v24, %v451_v8  ;;  %v3174_v25 = vrot.slane %v557_v9, %v3099_v38  ;;  %v419_v33 = vpop.f32.mrf.mxu0  ;;  %v3207_v40 = vcombine.high %v3160_v16, %v3160_v16 }
 0x10d   :  { %3892 = vst [vmem:[#allocation4_spill] sm:$0xff] %v3112_v55  ;;  %3893 = vst [vmem:[#allocation5_spill] sm:$0xff] %v3116_v62  ;;  %v3122_v61 = vrot.slane %v540_v57, %v3099_v38  ;;  %v3135_v4 = vcombine.high %v3116_v62, %v3116_v62  ;;  %v1700_v10 = vrot.slane %v1698_v56, 2  ;;  %v1701_v11 = vrot.slane %v3112_v55, 7 }
 0x10e   :  { %v2452_v59 = vrot.slane %v3116_v62, 9  ;;  %v591_v31 = vcombine.high %v477_v18, %v477_v18  ;;  %v3191_v32 = vrot.slane %v477_v18, %v3099_v38  ;;  %v476_v41 = vmax.f32 %v467_v22, 0.0 }
 0x10f   :  { %3894 = vst [vmem:[#allocation6_spill] sm:$0xff] %v3122_v61  ;;  %3895 = vst [vmem:[#allocation7_spill] sm:$0xff] %v3135_v4  ;;  %v3140_v12 = vcombine.high %v3122_v61, %v3122_v61  ;;  %v1327_v60 = vrot.slane %v3135_v4, 7  ;;  %v1330_v21 = vrot.slane %v3122_v61, 7  ;;  %v3178_v26 = vsel %vm3152_vm7, %v1700_v10, %v1701_v11 }
 0x110   :  { %v3212_v44 = vcombine.high %v3174_v25, %v3174_v25  ;;  %v3216_v46 = vcombine.high %v3191_v32, %v3191_v32  ;;  %v454_v48 = vmax.f32 %v445_v6, %v2705_v7  ;;  %v453_v51 = vmax.f32 %v444_v1, %v419_v33 }
 0x111   :  { %3896 = vst [vmem:[#allocation8_spill] sm:$0xff] %v3140_v12  ;;  %v2466_v17 = vrot.slane %v3140_v12, 9  ;;  %v3165_v19 = vsel %vm3152_vm7, %v2452_v59, %v1327_v60  ;;  %v1329_v20 = vrot.slane %v1327_v60, 2  ;;  %v671_v53 = vrot.slane %v3131_v2, 7 }
 0x112   :  { %v2431_v54 = vrot.slane %v3171_v23, 9  ;;  %v675_v57 = vrot.slane %v3157_v15, 7  ;;  %v2430_v63 = vrot.slane %v3160_v16, 9  ;;  %v574_v0 = vcombine.high %v476_v41, %v476_v41 }
 0x113   :  { %v3182_v27 = vsel %vm3152_vm7, %v2466_v17, %v1698_v56  ;;  %v3186_v28 = vsel %vm3152_vm7, %v1329_v20, %v1330_v21  ;;  %v3225_v56 = vrot.slane %v591_v31, %v3099_v38  ;;  %v469_v3 = vadd.f32 %v3090_v24, %v453_v51 }
 0x114   :  { %v2432_v49 = vrot.slane %v3174_v25, 9  ;;  %v3234_v58 = vrot.slane %v476_v41, %v3099_v38  ;;  %v470_v5 = vadd.f32 %v3090_v24, %v454_v48  ;;  %v682_v6 = vrot.slane %v3212_v44, 7 }
 0x115   :  { %v3880_v9 = vrot.slane %v3216_v46, 7  ;;  %v3242_v10 = vcombine.high %v3203_v39, %v3203_v39  ;;  %v3246_v11 = vcombine.high %v3225_v56, %v3225_v56  ;;  %v478_v59 = vmax.f32 %v469_v3, 0.0 }
 0x116   :  { %v655_v60 = vsel %vm3152_vm7, %v2428_v35, %v654_v43  ;;  %v656_v7 = vrot.slane %v654_v43, 2  ;;  %v699_v24 = vrot.slane %v3225_v56, 7  ;;  %v3252_v17 = vrot.slane %v574_v0, %v3099_v38 }
 0x117   :  { %v657_v18 = vrot.slane %v3143_v13, 7  ;;  %v661_v20 = vrot.slane %v3203_v39, 7  ;;  %v3258_v21 = vcombine.high %v3234_v58, %v3234_v58  ;;  %v3260_v22 = vmax.f32 %v470_v5, 0.0 }
 0x118   :  { %v608_v31 = vcombine.high %v478_v59, %v478_v59  ;;  %v3263_v33 = vrot.slane %v478_v59, %v3099_v38  ;;  %v698_v35 = vrot.slane %v3880_v9, 2  ;;  %v664_v43 = vrot.slane %v3242_v10, 7 }
 0x119   :  { %v663_v41 = vrot.slane %v661_v20, 2  ;;  %v668_v48 = vrot.slane %v3207_v40, 7  ;;  %v2435_v51 = vrot.slane %v3246_v11, 9  ;;  %v685_v0 = vrot.slane %v3234_v58, 7 }
 0x11a   :  { %v3272_v3 = vrot.slane %v608_v31, %v3099_v38  ;;  %v658_v5 = vsel %vm3152_vm7, %v656_v7, %v657_v18  ;;  %v3278_v59 = vcombine.high %v3252_v17, %v3252_v17  ;;  %v703_v36 = vrot.slane %v3263_v33, 7 }
 0x11b   :  { %v2429_v1 = vrot.slane %v3195_v34, 9  ;;  %v665_v8 = vsel %vm3152_vm7, %v663_v41, %v664_v43  ;;  %v2433_v9 = vrot.slane %v3258_v21, 9  ;;  %v689_v30 = vrot.slane %v3252_v17, 7 }
 0x11c   :  { %v625_v31 = vcombine.high %v3260_v22, %v3260_v22  ;;  %v3290_v7 = vrot.slane %v3260_v22, %v3099_v38  ;;  %v3294_v18 = vcombine.high %v3263_v33, %v3263_v33  ;;  %v669_v41 = vsel %vm3152_vm7, %v2430_v63, %v668_v48 }
 0x11d   :  { %v662_v37 = vsel %vm3152_vm7, %v2429_v1, %v661_v20  ;;  %v670_v43 = vrot.slane %v668_v48, 2  ;;  %v3302_v29 = vcombine.high %v3272_v3, %v3272_v3  ;;  %v705_v55 = vrot.slane %v703_v36, 2 }
 0x11e   :  { %v712_v12 = vcombine.low %v655_v60, %v658_v5  ;;  %v713_v45 = vcombine.low %v662_v37, %v665_v8  ;;  %v677_v61 = vrot.slane %v675_v57, 2  ;;  %v678_v62 = vrot.slane %v3220_v50, 7 }
 0x11f   :  { %v672_v22 = vsel %vm3152_vm7, %v670_v43, %v671_v53  ;;  %v3899_v1 = vcombine.low %v3165_v19, %v3186_v28  ;;  %v3900_v37 = vcombine.low %v3182_v27, %v3178_v26  ;;  %v706_v8 = vrot.slane %v3294_v18, 7 }
 0x120   :  { %v720_v63 = vrot.slane %v712_v12, %v3099_v38  ;;  %v3315_v48 = vrot.slane %v713_v45, %v3099_v38  ;;  %v729_v4 = vcombine.low %v669_v41, %v672_v22  ;;  %v676_v60 = vsel %vm3152_vm7, %v2431_v54, %v675_v57 }
 0x121   :  { %v3311_v20 = vrot.slane %v3899_v1, %v3099_v38  ;;  %v3321_v53 = vrot.slane %v3900_v37, %v3099_v38  ;;  %v679_v19 = vsel %vm3152_vm7, %v677_v61, %v678_v62  ;;  %v684_v28 = vrot.slane %v682_v6, 2 }
 0x122   :  { %v728_v12 = vcombine.low %v720_v63, %v3315_v48  ;;  %v3330_v45 = vrot.slane %v729_v4, %v3099_v38  ;;  %v730_v5 = vcombine.low %v676_v60, %v679_v19  ;;  %v683_v27 = vsel %vm3152_vm7, %v2432_v49, %v682_v6 }
 0x123   :  { %v1722_v26 = vcombine.low %v3311_v20, %v3321_v53  ;;  %v686_v41 = vsel %vm3152_vm7, %v684_v28, %v685_v0  ;;  %v691_v54 = vrot.slane %v689_v30, 2  ;;  %v692_v57 = vrot.slane %v3278_v59, 7 }
 0x124   :  { %2714 = vmatprep.mubr.msk.f32.mxu1 %vm780_vm8, %v728_v12  ;;  %v3341_v62 = vrot.slane %v730_v5, %v3099_v38  ;;  %v746_v61 = vcombine.low %v683_v27, %v686_v41  ;;  %v3901_v4 = vrot.slane %v3216_v46, 7  ;;  %v3902_v43 = vrot.slane %v3191_v32, 9 }
 0x125   :  { %v700_v49 = vsel %vm3152_vm7, %v698_v35, %v699_v24  ;;  %v690_v6 = vsel %vm3152_vm7, %v2433_v9, %v689_v30  ;;  %v693_v0 = vsel %vm3152_vm7, %v691_v54, %v692_v57  ;;  %v707_v1 = vsel %vm3152_vm7, %v705_v55, %v706_v8  ;;  %v644_v55 = vld [vmem:[%s3872_s3 + $0x10] sm:$0xff] }
 0x126   :  { %v697_v22 = vsel %vm3152_vm7, %v3902_v43, %v3901_v4  ;;  %v3359_v37 = vcombine.low %v3330_v45, %v3341_v62  ;;  %v1352_v60 = vcombine.low %v3341_v62, %v3311_v20  ;;  %v747_v19 = vcombine.low %v690_v6, %v693_v0  ;;  %v1460_v62 = vld [vmem:[%s3872_s3 + $0xa0] sm:$0xff] }
 0x127   :  { %v763_v63 = vcombine.low %v697_v22, %v700_v49  ;;  %v704_v24 = vsel %vm3152_vm7, %v2435_v51, %v703_v36  ;;  %v892_v30 = vcombine.low %v3171_v23, %v3157_v15  ;;  %v3368_v9 = vrot.slane %v625_v31, %v3099_v38  ;;  %v643_v31 = vld [vmem:[%s3872_s3 + $0x8] sm:$0xff]  ;;  %v642_v49 = vld [vmem:[%s3872_s3] sm:$0xff] }
 0x128   :  { %v764_v35 = vcombine.low %v704_v24, %v707_v1  ;;  %v875_v8 = vcombine.low %v3195_v34, %v3203_v39  ;;  %v1334_v28 = vrot.slane %v3302_v29, 7  ;;  %2715 = vmatmul.mubr.msk.f32.vlgmr.msra.gmra.mxu1 %vm780_vm8, %v3359_v37  ;;  %v754_v36 = vrot.slane %v746_v61, %v3099_v38 }
 0x129   :  { %v3380_v23 = vrot.slane %v747_v19, %v3099_v38  ;;  %v909_v51 = vcombine.low %v3258_v21, %v3252_v17  ;;  %2721 = vmatpush3.msra.mxu1 %v3068_v42  ;;  %v3389_v34 = vrot.slane %v763_v63, %v3099_v38  ;;  %v908_v27 = vcombine.low %v3174_v25, %v3212_v44 }
 0x12a   :  { %v3392_v12 = vrot.slane %v764_v35, %v3099_v38  ;;  %v3395_v5 = vrot.slane %v875_v8, %v3099_v38  ;;  %v3903_v42 = vcombine.low %v3160_v16, %v3207_v40  ;;  %v3407_v41 = vcombine.high %v3290_v7, %v3290_v7  ;;  %2722 = vmatprep.subr.mxu1 %v644_v55  ;;  %v1037_v8 = vld [vmem:[%s3872_s3 + $0x50] sm:$0xff] }
 0x12b   :  { %v762_v54 = vcombine.low %v754_v36, %v3380_v23  ;;  %v3904_v57 = vcombine.low %v3119_v47, %v3147_v52  ;;  %2723 = vmatpush3.msra.mxu1 %v644_v55  ;;  %v3419_v16 = vrot.slane %v909_v51, %v3099_v38  ;;  %v926_v4 = vcombine.low %v3246_v11, %v3263_v33 }
 0x12c   :  { %v3403_v21 = vrot.slane %v3903_v42, %v3099_v38  ;;  %v3416_v25 = vcombine.low %v3389_v34, %v3392_v12  ;;  %v1040_v43 = vcombine.low %v3203_v39, %v3242_v10  ;;  %v3426_v22 = vrot.slane %v892_v30, %v3099_v38  ;;  %2724 = vmatprep.subr.mxu1 %v643_v31 }
 0x12d   :  { %v882_v61 = vrot.slane %v3904_v57, %v3099_v38  ;;  %v1705_v47 = vrot.slane %v3368_v9, 7  ;;  %2717 = vmatprep.mubr.msk.f32.mxu1 %vm780_vm8, %v762_v54  ;;  %v1336_v0 = vrot.slane %v1334_v28, 2  ;;  %v1056_v11 = vcombine.low %v3207_v40, %v3131_v2  ;;  %2725 = vmatpush3.msra.mxu1 %v643_v31  ;;  %v1035_v57 = vld [vmem:[%s3872_s3 + $0x40] sm:$0xff] }
 0x12e   :  { %v925_v39 = vcombine.low %v3191_v32, %v3216_v46  ;;  %v3440_v10 = vcombine.high %v3368_v9, %v3368_v9  ;;  %2718 = vmatmul.mubr.msk.f32.gmra.mxu1 %vm780_vm8, %v3416_v25  ;;  %v916_v1 = vrot.slane %v908_v27, %v3099_v38  ;;  %v3447_v63 = vcombine.low %v3403_v21, %v3426_v22  ;;  %v1038_v32 = vld [vmem:[%s3872_s3 + $0x58] sm:$0xff] }
 0x12f   :  { %v890_v6 = vcombine.low %v882_v61, %v3395_v5  ;;  %v1337_v19 = vrot.slane %v3290_v7, 7  ;;  %v2453_v2 = vrot.slane %v3272_v3, 9  ;;  %v1039_v40 = vcombine.low %v3147_v52, %v3143_v13  ;;  %2726 = vmatprep.subr.mxu1 %v642_v49 }
 0x130   :  { %v2467_v24 = vrot.slane %v3407_v41, 9  ;;  %v924_v30 = vcombine.low %v916_v1, %v3419_v16  ;;  %v3460_v55 = vrot.slane %v926_v4, %v3099_v38  ;;  %v3463_v35 = vrot.slane %v1040_v43, %v3099_v38  ;;  %2727 = vmatpush3.msra.mxu1 %v642_v49 }
 0x131   :  { %2728 = vmatprep.mubr.msk.f32.mxu1 %vm780_vm8, %v890_v6  ;;  %v1074_v36 = vcombine.low %v3252_v17, %v3278_v59  ;;  %v1335_v13 = vsel %vm3152_vm7, %v2453_v2, %v1334_v28  ;;  %v1338_v52 = vsel %vm3152_vm7, %v1336_v0, %v1337_v19  ;;  %v1707_v51 = vrot.slane %v1705_v47, 2  ;;  %2734 = vmatprep.subr.mxu1 %v1038_v32  ;;  %v1206_v2 = vld [vmem:[%s3872_s3 + $0x70] sm:$0xff] }
 0x132   :  { %v1057_v31 = vcombine.low %v3157_v15, %v3220_v50  ;;  %2729 = vmatmul.mubr.msk.f32.vlgmr.msra.gmra.mxu1 %vm780_vm8, %v3447_v63  ;;  %v3479_v27 = vrot.slane %v925_v39, %v3099_v38  ;;  %v1354_v42 = vcombine.low %v1335_v13, %v1338_v52  ;;  %v1708_v17 = vrot.slane %v3440_v10, 7  ;;  %v1036_v15 = vld [vmem:[%s3872_s3 + $0x48] sm:$0xff]  ;;  %v3906_v39 = vld [vmem:[#allocation5_spill] sm:$0xff]  ;;  %v1204_v52 = vld [vmem:[%s3872_s3 + $0x60] sm:$0xff] }
 0x133   :  { %v1073_v59 = vcombine.low %v3212_v44, %v3234_v58  ;;  %2735 = vmatpush3.msra.mxu1 %v1038_v32  ;;  %2731 = vmatprep.mubr.msk.f32.mxu1 %vm780_vm8, %v924_v30  ;;  %v1047_v50 = vrot.slane %v1039_v40, %v3099_v38  ;;  %v3490_v28 = vrot.slane %v1056_v11, %v3099_v38  ;;  %v3905_v11 = vld [vmem:[#allocation7_spill] sm:$0xff] }
 0x134   :  { %2736 = vmatprep.subr.mxu1 %v1037_v8  ;;  %v3494_v54 = vcombine.low %v3479_v27, %v3460_v55  ;;  %v1091_v44 = vcombine.low %v3263_v33, %v3294_v18  ;;  %v3499_v58 = vrot.slane %v1354_v42, %v3099_v38  ;;  %v3506_v4 = vrot.slane %v1074_v36, %v3099_v38 }
 0x135   :  { %2737 = vmatpush3.msra.mxu1 %v1037_v8  ;;  %v1055_v61 = vcombine.low %v1047_v50, %v3463_v35  ;;  %v1706_v43 = vsel %vm3152_vm7, %v2467_v24, %v1705_v47  ;;  %v1709_v49 = vsel %vm3152_vm7, %v1707_v51, %v1708_v17  ;;  %v3513_v33 = vrot.slane %v1057_v31, %v3099_v38  ;;  %v1205_v24 = vld [vmem:[%s3872_s3 + $0x68] sm:$0xff]  ;;  %v1342_v31 = vld [vmem:[%s3872_s3 + $0x98] sm:$0xff] }
 0x136   :  { %2738 = vmatprep.subr.mxu1 %v1036_v15  ;;  %2732 = vmatmul.mubr.msk.f32.gmra.mxu1 %vm780_vm8, %v3494_v54  ;;  %v1090_v18 = vcombine.low %v3216_v46, %v3225_v56  ;;  %v1362_v6 = vcombine.low %v3392_v12, %v3499_v58  ;;  %v1081_v47 = vrot.slane %v1073_v59, %v3099_v38  ;;  %v1463_v59 = vld [vmem:[%s3872_s3 + $0xb8] sm:$0xff]  ;;  %v1461_v50 = vld [vmem:[%s3872_s3 + $0xa8] sm:$0xff] }
 0x137   :  { %2739 = vmatpush3.msra.mxu1 %v1036_v15  ;;  %2742 = vmatprep.mubr.msk.f32.mxu1 %vm780_vm8, %v1055_v61  ;;  %v1723_v0 = vcombine.low %v1706_v43, %v1709_v49  ;;  %v1209_v1 = vcombine.low %v3906_v39, %v3905_v11  ;;  %v3530_v46 = vcombine.low %v3490_v28, %v3513_v33  ;;  %v3907_v15 = vld [vmem:[#allocation6_spill] sm:$0xff]  ;;  %v1582_v43 = vld [vmem:[%s3872_s3 + $0xc8] sm:$0xff]  ;;  %v1827_v39 = vld [vmem:[%s3872_s3 + $0x110] sm:$0xff] }
 0x138   :  { %2740 = vmatprep.subr.mxu1 %v1035_v57  ;;  %v3533_v56 = vrot.slane %v1091_v44, %v3099_v38  ;;  %v1089_v19 = vcombine.low %v1081_v47, %v3506_v4  ;;  %v3545_v40 = vrot.slane %v1090_v18, %v3099_v38  ;;  %v1219_v13 = vcombine.low %v3272_v3, %v3302_v29  ;;  %v1712_v47 = vld [vmem:[%s3872_s3 + $0xf0] sm:$0xff] }
 0x139   :  { %2741 = vmatpush3.msra.mxu1 %v1035_v57  ;;  %v3540_v32 = vrot.slane %v1723_v0, %v3099_v38  ;;  %v3554_v8 = vrot.slane %v1209_v1, %v3099_v38  ;;  %v1208_v51 = vcombine.low %v3395_v5, %v3403_v21  ;;  %v1218_v5 = vcombine.low %v3419_v16, %v3479_v27  ;;  %v1341_v21 = vld [vmem:[%s3872_s3 + $0x90] sm:$0xff]  ;;  %v1339_v27 = vld [vmem:[%s3872_s3 + $0x80] sm:$0xff] }
 0x13a   :  { %2748 = vmatprep.subr.mxu1 %v1207_v14  ;;  %2743 = vmatmul.mubr.msk.f32.vlgmr.msra.gmra.mxu1 %vm780_vm8, %v3530_v46  ;;  %v3558_v36 = vcombine.low %v3545_v40, %v3533_v56  ;;  %v3576_v42 = vrot.slane %v1219_v13, %v3099_v38  ;;  %v1343_v16 = vcombine.low %v3315_v48, %v3330_v45  ;;  %v1462_v45 = vld [vmem:[%s3872_s3 + $0xb0] sm:$0xff] }
 0x13b   :  { %2749 = vmatpush3.msra.mxu1 %v1207_v14  ;;  %2745 = vmatprep.mubr.msk.f32.mxu1 %vm780_vm8, %v1089_v19  ;;  %v1731_v30 = vcombine.low %v3499_v58, %v3540_v32  ;;  %v1217_v3 = vcombine.low %v3426_v22, %v3554_v8  ;;  %v1340_v22 = vld [vmem:[%s3872_s3 + $0x88] sm:$0xff]  ;;  %v1353_v48 = vcombine.low %v3380_v23, %v3389_v34  ;;  %v3909_v57 = vld [vmem:[#allocation8_spill] sm:$0xff]  ;;  %v1825_v19 = vld [vmem:[%s3872_s3 + $0x100] sm:$0xff] }
 0x13c   :  { %2750 = vmatprep.subr.mxu1 %v1206_v2  ;;  %v1227_v17 = vcombine.low %v3460_v55, %v3576_v42  ;;  %v1465_v55 = vcombine.low %v3905_v11, %v3907_v15  ;;  %v1475_v23 = vcombine.low %v3302_v29, %v3290_v7  ;;  %v1584_v29 = vld [vmem:[%s3872_s3 + $0xd8] sm:$0xff]  ;;  %v3908_v34 = vld [vmem:[#allocation3_spill] sm:$0xff]  ;;  %v1474_v12 = vcombine.low %v3506_v4, %v3545_v40  ;;  %v1710_v11 = vld [vmem:[%s3872_s3 + $0xe0] sm:$0xff] }
 0x13d   :  { %2751 = vmatpush3.msra.mxu1 %v1206_v2  ;;  %v1585_v61 = vcombine.low %v3909_v57, %v3908_v34  ;;  %v1594_v18 = vcombine.low %v3407_v41, %v3368_v9  ;;  %v3910_v1 = vld [vmem:[#allocation4_spill] sm:$0xff]  ;;  %v1838_v20 = vcombine.low %v3368_v9, %v3440_v10  ;;  %v2222_v9 = vld [vmem:[%s3874_s5 + $0xf8] sm:$0xff]  ;;  %v2220_v32 = vld [vmem:[%s3874_s5 + $0xe8] sm:$0xff] }
 0x13e   :  { %2752 = vmatprep.subr.mxu1 %v1205_v24  ;;  %2746 = vmatmul.mubr.msk.f32.gmra.mxu1 %vm780_vm8, %v3558_v36  ;;  %v3616_v44 = vrot.slane %v1465_v55, %v3099_v38  ;;  %v2206_v10 = vld [vmem:[%s3874_s5 + $0x78] sm:$0xff]  ;;  %v2221_v58 = vld [vmem:[%s3874_s5 + $0xf0] sm:$0xff]  ;;  %v2204_v40 = vld [vmem:[%s3874_s5 + $0x68] sm:$0xff] }
 0x13f   :  { %2753 = vmatpush3.msra.mxu1 %v1205_v24  ;;  %2756 = vmatprep.mubr.msk.f32.mxu1 %vm780_vm8, %v1208_v51  ;;  %v1592_v49 = vrot.slane %v1585_v61, %v3099_v38  ;;  %v1601_v41 = vrot.slane %v1594_v18, %v3099_v38  ;;  %v2219_v24 = vld [vmem:[%s3874_s5 + $0xe0] sm:$0xff]  ;;  %v2217_v13 = vld [vmem:[%s3874_s5 + $0xd0] sm:$0xff]  ;;  %v2216_v51 = vld [vmem:[%s3874_s5 + $0xc8] sm:$0xff] }
 0x140   :  { %2754 = vmatprep.subr.mxu1 %v1204_v52  ;;  %v1473_v7 = vcombine.low %v3513_v33, %v3616_v44  ;;  %v1581_v33 = vld [vmem:[%s3872_s3 + $0xc0] sm:$0xff]  ;;  %2608 = vmatprep.subr.mxu0 %v2222_v9  ;;  %v2210_v55 = vld [vmem:[%s3874_s5 + $0x98] sm:$0xff] }
 0x141   :  { %2755 = vmatpush3.msra.mxu1 %v1204_v52  ;;  %v1593_v14 = vcombine.low %v3554_v8, %v1592_v49  ;;  %v1602_v0 = vcombine.low %v3576_v42, %v1601_v41  ;;  %2609 = vmatpush3.msra.mxu0 %v2206_v10  ;;  %v2218_v8 = vld [vmem:[%s3874_s5 + $0xd8] sm:$0xff]  ;;  %v2201_v52 = vld [vmem:[%s3874_s5 + $0x50] sm:$0xff]  ;;  %v2199_v42 = vld [vmem:[%s3874_s5 + $0x40] sm:$0xff] }
 0x142   :  { %2762 = vmatprep.subr.mxu1 %v1342_v31  ;;  %2757 = vmatmul.mubr.msk.f32.vlgmr.msra.gmra.mxu1 %vm780_vm8, %v1217_v3  ;;  %v2215_v3 = vld [vmem:[%s3874_s5 + $0xc0] sm:$0xff] }
 0x143   :  { %2763 = vmatpush3.msra.mxu1 %v1342_v31  ;;  %2759 = vmatprep.mubr.msk.f32.mxu1 %vm780_vm8, %v1218_v5  ;;  %v2200_v31 = vld [vmem:[%s3874_s5 + $0x48] sm:$0xff]  ;;  %v2214_v5 = vld [vmem:[%s3874_s5 + $0xb8] sm:$0xff]  ;;  %v2195_v15 = vld [vmem:[%s3874_s5 + $0x20] sm:$0xff] }
 0x144   :  { %2764 = vmatprep.subr.mxu1 %v1341_v21  ;;  %2610 = vmatprep.subr.mxu0 %v2221_v58 }
 0x145   :  { %2765 = vmatpush3.msra.mxu1 %v1341_v21  ;;  %v2198_v21 = vld [vmem:[%s3874_s5 + $0x38] sm:$0xff] }
 0x146   :  { %2766 = vmatprep.subr.mxu1 %v1340_v22  ;;  %2760 = vmatmul.mubr.msk.f32.gmra.mxu1 %vm780_vm8, %v1227_v17  ;;  %v2197_v17 = vld [vmem:[%s3874_s5 + $0x30] sm:$0xff] }
 0x147   :  { %2767 = vmatpush3.msra.mxu1 %v1340_v22  ;;  %2770 = vmatprep.mubr.msk.f32.mxu1 %vm780_vm8, %v1343_v16  ;;  %v2213_v22 = vld [vmem:[%s3874_s5 + $0xb0] sm:$0xff]  ;;  %v2212_v16 = vld [vmem:[%s3874_s5 + $0xa8] sm:$0xff] }
 0x148   :  { %2768 = vmatprep.subr.mxu1 %v1339_v27 }
 0x149   :  { %2769 = vmatpush3.msra.mxu1 %v1339_v27  ;;  %v2196_v27 = vld [vmem:[%s3874_s5 + $0x28] sm:$0xff] }
 0x14a   :  { %2776 = vmatprep.subr.mxu1 %v1463_v59  ;;  %2771 = vmatmul.mubr.msk.f32.vlgmr.msra.gmra.mxu1 %vm780_vm8, %v1352_v60  ;;  %v1464_v60 = vcombine.low %v3463_v35, %v3490_v28  ;;  %v3638_v35 = vrot.slane %v1475_v23, %v3099_v38  ;;  %v1583_v28 = vld [vmem:[%s3872_s3 + $0xd0] sm:$0xff]  ;;  %v2192_v23 = vld [vmem:[%s3874_s5 + $0x8] sm:$0xff] }
 0x14b   :  { %2777 = vmatpush3.msra.mxu1 %v1463_v59  ;;  %2773 = vmatprep.mubr.msk.f32.mxu1 %vm780_vm8, %v1353_v48  ;;  %v2211_v59 = vld [vmem:[%s3874_s5 + $0xa0] sm:$0xff]  ;;  %v2194_v48 = vld [vmem:[%s3874_s5 + $0x18] sm:$0xff] }
 0x14c   :  { %2778 = vmatprep.subr.mxu1 %v1462_v45  ;;  %v1483_v4 = vcombine.low %v3533_v56, %v3638_v35  ;;  %v1829_v56 = vcombine.low %v3908_v34, %v3910_v1 }
 0x14d   :  { %2779 = vmatpush3.msra.mxu1 %v1462_v45  ;;  %v2209_v45 = vld [vmem:[%s3874_s5 + $0x90] sm:$0xff] }
 0x14e   :  { %2780 = vmatprep.subr.mxu1 %v1461_v50  ;;  %2774 = vmatmul.mubr.msk.f32.gmra.mxu1 %vm780_vm8, %v1362_v6  ;;  %v1713_v6 = vld [vmem:[%s3872_s3 + $0xf8] sm:$0xff]  ;;  %v1836_v2 = vrot.slane %v1829_v56, %v3099_v38 }
 0x14f   :  { %2781 = vmatpush3.msra.mxu1 %v1461_v50  ;;  %2784 = vmatprep.mubr.msk.f32.mxu1 %vm780_vm8, %v1464_v60  ;;  %v2193_v50 = vld [vmem:[%s3874_s5 + $0x10] sm:$0xff] }
 0x150   :  { %2782 = vmatprep.subr.mxu1 %v1460_v62  ;;  %v1837_v53 = vcombine.low %v3616_v44, %v1836_v2  ;;  %v2208_v44 = vld [vmem:[%s3874_s5 + $0x88] sm:$0xff] }
 0x151   :  { %2783 = vmatpush3.msra.mxu1 %v1460_v62 }
 0x152   :  { %2790 = vmatprep.subr.mxu1 %v1584_v29  ;;  %2785 = vmatmul.mubr.msk.f32.vlgmr.msra.gmra.mxu1 %vm780_vm8, %v1473_v7 }
 0x153   :  { %2791 = vmatpush3.msra.mxu1 %v1584_v29  ;;  %2787 = vmatprep.mubr.msk.f32.mxu1 %vm780_vm8, %v1474_v12 }
 0x154   :  { %2792 = vmatprep.subr.mxu1 %v1583_v28 }
 0x155   :  { %2793 = vmatpush3.msra.mxu1 %v1583_v28 }
 0x156   :  { %2794 = vmatprep.subr.mxu1 %v1582_v43  ;;  %2788 = vmatmul.mubr.msk.f32.gmra.mxu1 %vm780_vm8, %v1483_v4 }
 0x157   :  { %2795 = vmatpush3.msra.mxu1 %v1582_v43  ;;  %2798 = vmatprep.mubr.msk.f32.mxu1 %vm780_vm8, %v3447_v63  ;;  %v1711_v63 = vld [vmem:[%s3872_s3 + $0xe8] sm:$0xff] }
 0x158   :  { %2796 = vmatprep.subr.mxu1 %v1581_v33 }
 0x159   :  { %2797 = vmatpush3.msra.mxu1 %v1581_v33 }
 0x15a   :  { %2804 = vmatprep.subr.mxu1 %v1713_v6  ;;  %2799 = vmatmul.mubr.msk.f32.vlgmr.msra.gmra.mxu1 %vm780_vm8, %v1593_v14 }
 0x15b   :  { %2805 = vmatpush3.msra.mxu1 %v1713_v6  ;;  %2801 = vmatprep.mubr.msk.f32.mxu1 %vm780_vm8, %v3494_v54  ;;  %v1828_v54 = vld [vmem:[%s3872_s3 + $0x118] sm:$0xff] }
 0x15c   :  { %2806 = vmatprep.subr.mxu1 %v1712_v47 }
 0x15d   :  { %2807 = vmatpush3.msra.mxu1 %v1712_v47 }
 0x15e   :  { %2808 = vmatprep.subr.mxu1 %v1711_v63  ;;  %2802 = vmatmul.mubr.msk.f32.gmra.mxu1 %vm780_vm8, %v1602_v0 }
 0x15f   :  { %2809 = vmatpush3.msra.mxu1 %v1711_v63  ;;  %2812 = vmatprep.mubr.msk.f32.mxu1 %vm780_vm8, %v3359_v37  ;;  %v1826_v37 = vld [vmem:[%s3872_s3 + $0x108] sm:$0xff] }
 0x160   :  { %2810 = vmatprep.subr.mxu1 %v1710_v11 }
 0x161   :  { %2811 = vmatpush3.msra.mxu1 %v1710_v11 }
 0x162   :  { %2818 = vmatprep.subr.mxu1 %v1828_v54  ;;  %2813 = vmatmul.mubr.msk.f32.vlgmr.msra.gmra.mxu1 %vm780_vm8, %v1722_v26  ;;  %v1845_v26 = vrot.slane %v1838_v20, %v3099_v38 }
 0x163   :  { %2819 = vmatpush3.msra.mxu1 %v1828_v54  ;;  %2815 = vmatprep.mubr.msk.f32.mxu1 %vm780_vm8, %v3416_v25 }
 0x164   :  { %2820 = vmatprep.subr.mxu1 %v1827_v39  ;;  %v1846_v25 = vcombine.low %v3638_v35, %v1845_v26 }
 0x165   :  { %2821 = vmatpush3.msra.mxu1 %v1827_v39 }
 0x166   :  { %2822 = vmatprep.subr.mxu1 %v1826_v37  ;;  %2816 = vmatmul.mubr.msk.f32.gmra.mxu1 %vm780_vm8, %v1731_v30  ;;  %v2203_v30 = vld [vmem:[%s3874_s5 + $0x60] sm:$0xff] }
 0x167   :  { %2823 = vmatpush3.msra.mxu1 %v1826_v37  ;;  %2826 = vmatprep.mubr.msk.f32.mxu1 %vm780_vm8, %v3530_v46  ;;  %v2205_v46 = vld [vmem:[%s3874_s5 + $0x70] sm:$0xff] }
 0x168   :  { %2824 = vmatprep.subr.mxu1 %v1825_v19  ;;  %2611 = vmatpush3.msra.mxu0 %v2205_v46 }
 0x169   :  { %2825 = vmatpush3.msra.mxu1 %v1825_v19  ;;  %2612 = vmatprep.subr.mxu0 %v2220_v32 }
 0x16a   :  { %2827 = vmatmul.mubr.msk.f32.vlgmr.msra.gmra.mxu1 %vm780_vm8, %v1837_v53  ;;  %2613 = vmatpush3.msra.mxu0 %v2204_v40 }
 0x16b   :  { %2829 = vmatprep.mubr.msk.f32.mxu1 %vm780_vm8, %v3558_v36  ;;  %2614 = vmatprep.subr.mxu0 %v2219_v24  ;;  %v2202_v36 = vld [vmem:[%s3874_s5 + $0x58] sm:$0xff] }
 0x16c   :  { %2615 = vmatpush3.msra.mxu0 %v2203_v30 }
 0x16d   :  { %2616 = vmatprep.subr.mxu0 %v2218_v8 }
 0x16e   :  { %2830 = vmatmul.mubr.msk.f32.gmra.mxu1 %vm780_vm8, %v1846_v25  ;;  %2617 = vmatpush3.msra.mxu0 %v2202_v36 }
 0x16f   :  { %2618 = vmatprep.subr.mxu0 %v2217_v13 }
 0x170   :  { %2619 = vmatpush3.msra.mxu0 %v2201_v52 }
 0x171   :  { %2620 = vmatprep.subr.mxu0 %v2216_v51 }
 0x172   :  { %2621 = vmatpush3.msra.mxu0 %v2200_v31 }
 0x173   :  { %2622 = vmatprep.subr.mxu0 %v2215_v3 }
 0x174   :  { %2623 = vmatpush3.msra.mxu0 %v2199_v42 }
 0x175   :  { %2624 = vmatprep.subr.mxu0 %v2214_v5 }
 0x176   :  { %2625 = vmatpush3.msra.mxu0 %v2198_v21 }
 0x177   :  { %2626 = vmatprep.subr.mxu0 %v2213_v22 }
 0x178   :  { %2627 = vmatpush3.msra.mxu0 %v2197_v17 }
 0x179   :  { %2628 = vmatprep.subr.mxu0 %v2212_v16 }
 0x17a   :  { %2629 = vmatpush3.msra.mxu0 %v2196_v27 }
 0x17b   :  { %2630 = vmatprep.subr.mxu0 %v2211_v59 }
 0x17c   :  { %2631 = vmatpush3.msra.mxu0 %v2195_v15 }
 0x17d   :  { %2632 = vmatprep.subr.mxu0 %v2210_v55 }
 0x17e   :  { %2633 = vmatpush3.msra.mxu0 %v2194_v48 }
 0x17f   :  { %2634 = vmatprep.subr.mxu0 %v2209_v45 }
 0x180   :  { %2635 = vmatpush3.msra.mxu0 %v2193_v50 }
 0x181   :  { %2636 = vmatprep.subr.mxu0 %v2208_v44 }
 0x182   :  { %2637 = vmatpush3.msra.mxu0 %v2192_v23 }
 0x1e8   :  { %v2716_v62 = vpop.f32.mrf.mxu1 }
 0x1ea   :  { %v855_v60 = vpop.f32.mrf.mxu1 }
 0x1ee   :  { %v2719_v29 = vpop.f32.mrf.mxu1 }
 0x1f0   :  { %v865_v7 = vpop.f32.mrf.mxu1 }
 0x1f2   :  { %v2730_v34 = vpop.f32.mrf.mxu1 }
 0x1f3   :  { %v1022_v37 = vadd.f32 %v2730_v34, %v2716_v62  ;;  %v2492_v62 = vld [vmem:[%s3875_s4] ss:$0 sm:$0xff] }
 0x1f4   :  { %v1016_v57 = vpop.f32.mrf.mxu1 }
 0x1f5   :  { %v1017_v2 = vadd.f32 %v1016_v57, %v855_v60 }
 0x1f6   :  { %v2733_v61 = vpop.f32.mrf.mxu1 }
 0x1f7   :  { %v1032_v9 = vadd.f32 %v2733_v61, %v2719_v29 }
 0x1f8   :  { %v1026_v35 = vpop.f32.mrf.mxu1 }
 0x1f9   :  { %v1027_v32 = vadd.f32 %v1026_v35, %v865_v7 }
 0x1fa   :  { %v2744_v12 = vpop.f32.mrf.mxu1 }
 0x1fb   :  { %v1201_v20 = vadd.f32 %v2744_v12, %v1022_v37 }
 0x1fc   :  { %v1181_v28 = vpop.f32.mrf.mxu1 }
 0x1fd   :  { %v1200_v26 = vadd.f32 %v1181_v28, %v1017_v2 }
 0x1fe   :  { %v2747_v43 = vpop.f32.mrf.mxu1 }
 0x1ff   :  { %v1203_v40 = vadd.f32 %v2747_v43, %v1032_v9  ;;  %v3815_v43 = vrot.slane %v2492_v62, %v3099_v38 }
 0x200   :  { %v1191_v49 = vpop.f32.mrf.mxu1 }
 0x201   :  { %v1202_v36 = vadd.f32 %v1191_v49, %v1027_v32  ;;  %v3911_v49 = vld [vmem:[#allocation2_spill] sm:$0xff] }
 0x202   :  { %v2758_v4 = vpop.f32.mrf.mxu1 }
 0x203   :  { %v1322_v25 = vadd.f32 %v2758_v4, %v1201_v20  ;;  %v3818_v4 = vsub.s32 0, %v3911_v49 }
 0x204   :  { %v1302_v33 = vpop.f32.mrf.mxu1 }
 0x205   :  { %v1321_v58 = vadd.f32 %v1302_v33, %v1200_v26 }
 0x206   :  { %v2761_v18 = vpop.f32.mrf.mxu1 }
 0x207   :  { %v1324_v13 = vadd.f32 %v2761_v18, %v1203_v40 }
 0x208   :  { %v1312_v6 = vpop.f32.mrf.mxu1 }
 0x209   :  { %v1323_v3 = vadd.f32 %v1312_v6, %v1202_v36 }
 0x20a   :  { %v2772_v14 = vpop.f32.mrf.mxu1 }
 0x20b   :  { %v1457_v46 = vadd.f32 %v2772_v14, %v1322_v25 }
 0x20c   :  { %v1437_v47 = vpop.f32.mrf.mxu1 }
 0x20d   :  { %v1456_v30 = vadd.f32 %v1437_v47, %v1321_v58 }
 0x20e   :  { %v2775_v41 = vpop.f32.mrf.mxu1 }
 0x20f   :  { %v1459_v42 = vadd.f32 %v2775_v41, %v1324_v13 }
 0x210   :  { %v1447_v63 = vpop.f32.mrf.mxu1 }
 0x211   :  { %v1458_v17 = vadd.f32 %v1447_v63, %v1323_v3 }
 0x212   :  { %v2786_v0 = vpop.f32.mrf.mxu1 }
 0x213   :  { %v1578_v8 = vadd.f32 %v2786_v0, %v1457_v46 }
 0x214   :  { %v1558_v11 = vpop.f32.mrf.mxu1 }
 0x215   :  { %v1577_v51 = vadd.f32 %v1558_v11, %v1456_v30 }
 0x216   :  { %v2789_v54 = vpop.f32.mrf.mxu1 }
 0x217   :  { %v1580_v16 = vadd.f32 %v2789_v54, %v1459_v42 }
 0x218   :  { %v1568_v39 = vpop.f32.mrf.mxu1 }
 0x219   :  { %v1579_v55 = vadd.f32 %v1568_v39, %v1458_v17 }
 0x21a   :  { %v2800_v1 = vpop.f32.mrf.mxu1 }
 0x21b   :  { %v1693_v31 = vadd.f32 %v2800_v1, %v1578_v8  ;;  %v2113_v8 = vrot.slane %v3815_v43, 1 }
 0x21c   :  { %v1673_v56 = vpop.f32.mrf.mxu1 }
 0x21d   :  { %v1692_v21 = vadd.f32 %v1673_v56, %v1577_v51 }
 0x21e   :  { %v2803_v19 = vpop.f32.mrf.mxu1 }
 0x21f   :  { %v1695_v48 = vadd.f32 %v2803_v19, %v1580_v16 }
 0x220   :  { %v1683_v53 = vpop.f32.mrf.mxu1 }
 0x221   :  { %v1694_v60 = vadd.f32 %v1683_v53, %v1579_v55 }
 0x222   :  { %v2814_v10 = vpop.f32.mrf.mxu1 }
 0x223   :  { %v1822_v22 = vadd.f32 %v2814_v10, %v1693_v31 }
 0x224   :  { %v1802_v24 = vpop.f32.mrf.mxu1 }
 0x225   :  { %v1821_v59 = vadd.f32 %v1802_v24, %v1692_v21 }
 0x226   :  { %v2817_v52 = vpop.f32.mrf.mxu1 }
 0x227   :  { %v1824_v29 = vadd.f32 %v2817_v52, %v1695_v48 }
 0x228   :  { %v1812_v5 = vpop.f32.mrf.mxu1 }
 0x229   :  { %v1823_v33 = vadd.f32 %v1812_v5, %v1694_v60 }
 0x22a   :  { %v2828_v27 = vpop.f32.mrf.mxu1 }
 0x22b   :  { %v1937_v15 = vadd.f32 %v2828_v27, %v1822_v22  ;;  %v2207_v27 = vld [vmem:[%s3874_s5 + $0x80] sm:$0xff] }
 0x22c   :  { %v1917_v45 = vpop.f32.mrf.mxu1  ;;  %2638 = vmatprep.subr.mxu0 %v2207_v27 }
 0x22d   :  { %v1961_v50 = vcombine.high %v1937_v15, %v1937_v15  ;;  %v1968_v44 = vrot.slane %v1937_v15, %v3099_v38  ;;  %v1936_v23 = vadd.f32 %v1917_v45, %v1821_v59  ;;  %v2191_v59 = vld [vmem:[%s3874_s5] sm:$0xff]  ;;  %s2848_s5 = smov 64  }
 0x22e   :  { %v2831_v7 = vpop.f32.mrf.mxu1  ;;  %2639 = vmatpush3.msra.mxu0 %v2191_v59 }
 0x22f   :  { %v1975_v34 = vrot.slane %v1961_v50, %v3099_v38  ;;  %v1976_v57 = vcombine.high %v1968_v44, %v1968_v44  ;;  %v2478_v61 = vrot.slane %v1968_v44, 9  ;;  %v1944_v35 = vcombine.high %v1936_v23, %v1936_v23 }
 0x230   :  { %v1951_v12 = vrot.slane %v1936_v23, %v3099_v38  ;;  %v1939_v28 = vadd.f32 %v2831_v7, %v1824_v29  ;;  %v1927_v20 = vpop.f32.mrf.mxu1 }
 0x231   :  { %v1977_v18 = vcombine.high %v1975_v34, %v1975_v34  ;;  %v2479_v6 = vrot.slane %v1976_v57, 9  ;;  %v2054_v14 = vmax.f32 %v1968_v44, %v2478_v61  ;;  %v1958_v47 = vrot.slane %v1944_v35, %v3099_v38 }
 0x232   :  { %v1959_v41 = vcombine.high %v1951_v12, %v1951_v12  ;;  %v2476_v63 = vrot.slane %v1951_v12, 9  ;;  %v1995_v0 = vcombine.high %v1939_v28, %v1939_v28  ;;  %v2486_v39 = vrot.slane %v1975_v34, 9 }
 0x233   :  { %v2055_v11 = vmax.f32 %v1976_v57, %v2479_v6  ;;  %v2062_v54 = vmax.f32 %v2054_v14, %v1975_v34  ;;  %v2002_v1 = vrot.slane %v1939_v28, %v3099_v38  ;;  %v2487_v56 = vrot.slane %v1977_v18, 9 }
 0x234   :  { %v1960_v37 = vcombine.high %v1958_v47, %v1958_v47  ;;  %v2477_v19 = vrot.slane %v1959_v41, 9  ;;  %v2052_v2 = vmax.f32 %v1951_v12, %v2476_v63  ;;  %v2009_v25 = vrot.slane %v1995_v0, %v3099_v38 }
 0x235   :  { %v2063_v53 = vmax.f32 %v2055_v11, %v1977_v18  ;;  %v2094_v26 = vmax.f32 %v2062_v54, %v2486_v39  ;;  %v2010_v9 = vcombine.high %v2002_v1, %v2002_v1  ;;  %v2484_v46 = vrot.slane %v1958_v47, 9 }
 0x236   :  { %v2053_v10 = vmax.f32 %v1959_v41, %v2477_v19  ;;  %v2060_v58 = vmax.f32 %v2052_v2, %v1958_v47  ;;  %v2482_v32 = vrot.slane %v2002_v1, 9  ;;  %v2011_v40 = vcombine.high %v2009_v25, %v2009_v25 }
 0x237   :  { %v2483_v24 = vrot.slane %v2010_v9, 9  ;;  %v1938_v30 = vadd.f32 %v1927_v20, %v1823_v33  ;;  %v2095_v51 = vmax.f32 %v2063_v53, %v2487_v56  ;;  %v2485_v31 = vrot.slane %v1960_v37, 9 }
 0x238   :  { %v2061_v36 = vmax.f32 %v2053_v10, %v1960_v37  ;;  %v2092_v13 = vmax.f32 %v2060_v58, %v2484_v46  ;;  %v2058_v52 = vmax.f32 %v2002_v1, %v2482_v32  ;;  %v2490_v22 = vrot.slane %v2009_v25, 9 }
 0x239   :  { %v2059_v3 = vmax.f32 %v2010_v9, %v2483_v24  ;;  %v1978_v42 = vcombine.high %v1938_v30, %v1938_v30  ;;  %v1985_v5 = vrot.slane %v1938_v30, %v3099_v38  ;;  %v2491_v17 = vrot.slane %v2011_v40, 9 }
 0x23a   :  { %v2066_v21 = vmax.f32 %v2058_v52, %v2009_v25  ;;  %v2118_v16 = vadd.f32 %v3815_v43, %v2094_v26  ;;  %v2119_v44 = vadd.f32 %v2113_v8, %v2095_v51  ;;  %v2093_v23 = vmax.f32 %v2061_v36, %v2485_v31  ;;  %v2304_v36 = vld [vmem:[%s3876_s7 + $0x18] sm:$0xff]  ;;  %v2301_v52 = vld [vmem:[%s3876_s7] sm:$0xff] }
 0x23b   :  { %v2067_v15 = vmax.f32 %v2059_v3, %v2011_v40  ;;  %v1992_v55 = vrot.slane %v1978_v42, %v3099_v38  ;;  %v1993_v48 = vcombine.high %v1985_v5, %v1985_v5  ;;  %v2480_v45 = vrot.slane %v1985_v5, 9  ;;  %v2493_v31 = vld [vmem:[%s3877_s6] ss:$0 sm:$0xff] }
 0x23c   :  { %v2098_v50 = vmax.f32 %v2066_v21, %v2490_v22  ;;  %v2126_v62 = vmax.f32 %v2118_v16, 0.0  ;;  %v2127_v49 = vmax.f32 %v2119_v44, 0.0  ;;  %v2117_v33 = vadd.f32 %v2113_v8, %v2093_v23  ;;  %v2496_v22 = vld [vmem:[%s3878_s8] ss:$0 sm:$0xff] }
 0x23d   :  { %v1994_v60 = vcombine.high %v1992_v55, %v1992_v55  ;;  %v2481_v29 = vrot.slane %v1993_v48, 9  ;;  %v2056_v7 = vmax.f32 %v1985_v5, %v2480_v45  ;;  %v2099_v34 = vmax.f32 %v2067_v15, %v2491_v17 }
 0x23e   :  { %v2122_v57 = vadd.f32 %v3815_v43, %v2098_v50  ;;  %v2488_v12 = vrot.slane %v1992_v55, 9  ;;  %v2164_v38 = vrot.slane %v2126_v62, %v3818_v4  ;;  %v2116_v41 = vadd.f32 %v3815_v43, %v2092_v13  ;;  %v2302_v13 = vld [vmem:[%s3876_s7 + $0x8] sm:$0xff] }
 0x23f   :  { %v2057_v61 = vmax.f32 %v1993_v48, %v2481_v29  ;;  %v2064_v35 = vmax.f32 %v2056_v7, %v1992_v55  ;;  %v2123_v28 = vadd.f32 %v2113_v8, %v2099_v34  ;;  %v2489_v14 = vrot.slane %v1994_v60, 9 }
 0x240   :  { %v2130_v18 = vmax.f32 %v2122_v57, 0.0  ;;  %v2124_v39 = vmax.f32 %v2116_v41, 0.0  ;;  %v2176_v1 = vrot.slane %v2127_v49, %v3818_v4  ;;  %v2125_v2 = vmax.f32 %v2117_v33, 0.0 }
 0x241   :  { %v2065_v6 = vmax.f32 %v2057_v61, %v1994_v60  ;;  %v2096_v47 = vmax.f32 %v2064_v35, %v2488_v12  ;;  %v2131_v63 = vmax.f32 %v2123_v28, 0.0 }
 0x242   :  { %v2168_v0 = vrot.slane %v2130_v18, %v3818_v4  ;;  %v2137_v53 = vrot.slane %v2124_v39, %v3818_v4 }
 0x243   :  { %v2097_v11 = vmax.f32 %v2065_v6, %v2489_v14  ;;  %v2120_v54 = vadd.f32 %v3815_v43, %v2096_v47  ;;  %v2180_v56 = vrot.slane %v2131_v63, %v3818_v4  ;;  %v2150_v43 = vrot.slane %v2125_v2, %v3818_v4 }
 0x244   :  { %v2169_v37 = vsel %vm2142_vm9, %v2168_v0, %v2164_v38 }
 0x245   :  { %v2121_v19 = vadd.f32 %v2113_v8, %v2097_v11  ;;  %v2128_v20 = vmax.f32 %v2120_v54, 0.0  ;;  %v2181_v26 = vsel %vm2142_vm9, %v2180_v56, %v2176_v1  ;;  %v2849_v8 = vmov 0.0  }
 0x246   :  { %2182 = vrot.lane.b32.xlu0 %v2181_v26, %s2848_s5  ;;  %2832 = vmatprep.subr.mxu1 %v2849_v8 }
 0x247   :  { %v2129_v25 = vmax.f32 %v2121_v19, 0.0  ;;  %v2141_v9 = vrot.slane %v2128_v20, %v3818_v4  ;;  %2833 = vmatpush3.msra.mxu1 %v2304_v36  ;;  %2840 = vmatprep.mubr.msk.f32.mxu1 %vm2850_vm12, %v2849_v8 }
 0x248   :  { %2834 = vmatprep.subr.mxu1 %v2849_v8 }
 0x249   :  { %v2154_v10 = vrot.slane %v2129_v25, %v3818_v4  ;;  %v2143_v58 = vsel %vm2142_vm9, %v2141_v9, %v2137_v53  ;;  %v2303_v4 = vld [vmem:[%s3876_s7 + $0x10] sm:$0xff] }
 0x24a   :  { %2835 = vmatpush3.msra.mxu1 %v2303_v4 }
 0x24b   :  { %v2155_v46 = vsel %vm2142_vm9, %v2154_v10, %v2150_v43  ;;  %2836 = vmatprep.subr.mxu1 %v2849_v8 }
 0x24c   :  { %2156 = vrot.lane.b32.xlu0 %v2155_v46, %s2848_s5  ;;  %2837 = vmatpush3.msra.mxu1 %v2302_v13 }
 0x24d   :  { %2838 = vmatprep.subr.mxu1 %v2849_v8 }
 0x24e   :  { %2839 = vmatpush3.msra.mxu1 %v2301_v52 }
 0x2b8   :  { %v2183_v32 = vpop.permute.xlu0 %2182 }
 0x2b9   :  { %v2187_v40 = vsel %vm2185_vm10, %v2169_v37, %v2183_v32 }
 0x2ba   :  { %2494 = vmatprep.mubr.msk.f32.mxu0 %vm2188_vm11, %v2187_v40 }
 0x2be   :  { %v2157_v24 = vpop.permute.xlu0 %2156 }
 0x2bf   :  { %v2186_v30 = vsel %vm2185_vm10, %v2143_v58, %v2157_v24 }
 0x2c0   :  { %2495 = vmatmul.mubr.msk.f32.vlgmr.msra.gmra.mxu0 %vm2188_vm11, %v2186_v30 }
 0x380   :  { %v2640_v51 = vpop.f32.mrf.mxu0 }
 0x382   :  { %v2641_v3 = vpop.f32.mrf.mxu0 }
 0x383   :  { %v2642_v42 = vadd.f32 %v2641_v3, %v2640_v51 }
 0x385   :  { %v2297_v5 = vadd.f32 %v2642_v42, %v2493_v31 }
 0x387   :  { %v2300_v21 = vmax.f32 %v2297_v5, 0.0 }
 0x389   :  { %2841 = vmatmul.mubr.msk.f32.vlgmr.msra.gmra.mxu1 %vm780_vm8, %v2300_v21 }
 0x449   :  { %v2381_v17 = vpop.f32.mrf.mxu1 }
 0x44a   :  { %v2382_v16 = vadd.f32 %v2496_v22, %v2381_v17 }
 0x44b   :  { %v2842_v27 = vpop.f32.mrf.mxu1 }
 0x44c   :  { %2385 = vst [vmem:[%s3879_s9] sm:$0xff] %v2382_v16 }

</bundles_post_ra>
